<compile_context>
chip_gen: v5e
topology: v5e:2x2
jax: 0.10.0
libtpu: 0.0.40
codegen_flags: <defaults>
</compile_context>

<pallas_src>
import functools
import math

import jax
import jax.numpy as jnp
from jax import lax
from jax.experimental import pallas as pl
from jax.experimental.pallas import tpu as pltpu


def _round_up(x, m):
    return -(-x // m) * m


def _group_norm_kernel(x_ref, gamma_ref, beta_ref, o_ref, *, eps, inv_count):
    # x_ref / o_ref: (1, Gb, cg, S)   whole groups only
    # gamma_ref / beta_ref: (Gb, cg, 1)
    x = x_ref[0].astype(jnp.float32)                                   # (Gb, cg, S)

    # Pass 1: per-group mean (lane reduce, then sublane reduce over cg).
    s = jnp.sum(jnp.sum(x, axis=-1, keepdims=True), axis=-2, keepdims=True)
    mean = s * inv_count                                               # (Gb, 1, 1)

    # Pass 2: shifted variance (numerically stable); x is dead after this.
    d = x - mean                                                       # (Gb, cg, S)
    sq = jnp.sum(jnp.sum(d * d, axis=-1, keepdims=True), axis=-2, keepdims=True)
    var = sq * inv_count                                               # (Gb, 1, 1)
    rstd = lax.rsqrt(var + eps)                                        # EUP slot

    # y = (x - mean) * rstd * gamma + beta  ==  d * scale + beta
    scale = gamma_ref[...].astype(jnp.float32) * rstd                  # (Gb, cg, 1)
    o_ref[0] = (d * scale + beta_ref[...].astype(jnp.float32)).astype(o_ref.dtype)


def _choose_groups_per_block(G, N, per_group_in_bytes, per_group_step_bytes,
                             budget_bytes, min_steps=4,
                             min_block_in_bytes=512 * 1024):
    divisors = [d for d in range(1, G + 1) if G % d == 0]
    fitting = [d for d in divisors if d * per_group_step_bytes <= budget_bytes]
    if not fitting:
        # TODO(synk): even one group exceeds the VMEM budget -> needs the
        # spatial-split path (running sum/sumsq + second normalize sweep).
        return 1
    gb = fitting[-1]                    # largest block that fits -> fewest steps
    if N * (G // gb) >= min_steps:
        return gb
    # Not enough grid steps to pipeline / feed both TensorCores: shrink the
    # block, but only while it stays reasonably large (the kernel is HBM-bound;
    # per-step overhead ~0.35us is negligible above ~0.5 MiB of input).
    for d in reversed(fitting):
        if N * (G // d) >= min_steps and d * per_group_in_bytes >= min_block_in_bytes:
            return d
    # At minimum try to give the second TensorCore (v7x) some work.
    for d in reversed(fitting):
        if N * (G // d) >= 2:
            return d
    return gb


def group_norm_pallas(x, gamma, beta, *, num_groups=16, eps=1e-6):
    """GroupNorm forward matching torch.nn.GroupNorm(num_groups, C, eps, affine=True).

    x: (N, C, *spatial)   gamma, beta: (C,)
    Returns an array of the same shape/dtype as x.
    """
    N, C = x.shape[0], x.shape[1]
    assert C % num_groups == 0, "channels must be divisible by num_groups"
    G = num_groups
    cg = C // G
    S = int(math.prod(x.shape[2:])) if x.ndim > 2 else 1

    # Pure reshapes only (row-major contiguous; no transpose, no HBM traffic).
    x4 = x.reshape(N, G, cg, S)
    g3 = gamma.reshape(G, cg, 1)
    b3 = beta.reshape(G, cg, 1)

    # --- per-step VMEM accounting (padded to the (8, 128) VMEM tile) ---
    itemsize = jnp.dtype(x.dtype).itemsize
    padded_pg = _round_up(cg, 8) * _round_up(S, 128)       # padded elems / group
    in_pg = padded_pg * itemsize
    out_pg = padded_pg * itemsize
    f32_tmp_pg = padded_pg * 4 * 3                          # upcast, d, transient d*d
    step_pg = 2 * in_pg + 2 * out_pg + f32_tmp_pg           # double-buffered in/out

    VMEM_BUDGET = 24 * 2**20                                # safe on v5e/v6e/v7x
    Gb = _choose_groups_per_block(G, N, in_pg, step_pg, VMEM_BUDGET)
    n_blocks = G // Gb

    est_step_bytes = Gb * step_pg
    vmem_limit = int(min(max(est_step_bytes * 1.25, 32 * 2**20), 64 * 2**20))

    kernel = functools.partial(_group_norm_kernel, eps=eps,
                               inv_count=1.0 / float(cg * S))

    cost = pl.CostEstimate(
        flops=7 * N * C * S,                # 2 reduction passes + fused epilogue
        transcendentals=N * G,              # rsqrt per group
        bytes_accessed=N * C * S * 2 * itemsize + 2 * C * 4,
    )

    out = pl.pallas_call(
        kernel,
        out_shape=jax.ShapeDtypeStruct((N, G, cg, S), x.dtype),
        grid_spec=pltpu.PrefetchScalarGridSpec(
            num_scalar_prefetch=0,
            grid=(N, n_blocks),
            in_specs=[
                pl.BlockSpec((1, Gb, cg, S), lambda n, g: (n, g, 0, 0)),
                pl.BlockSpec((Gb, cg, 1), lambda n, g: (g, 0, 0)),
                pl.BlockSpec((Gb, cg, 1), lambda n, g: (g, 0, 0)),
            ],
            out_specs=pl.BlockSpec((1, Gb, cg, S), lambda n, g: (n, g, 0, 0)),
        ),
        compiler_params=pltpu.CompilerParams(
            dimension_semantics=("parallel", "parallel"),
            vmem_limit_bytes=vmem_limit,
        ),
        cost_estimate=cost,
    )(x4, g3, b3)

    return out.reshape(x.shape)


def _reference(x, gamma, beta, num_groups=16, eps=1e-6):
    """Pure-JAX reference matching torch.nn.GroupNorm semantics."""
    N, C = x.shape[0], x.shape[1]
    spatial = x.shape[2:]
    xg = x.astype(jnp.float32).reshape(N, num_groups, -1)
    mean = jnp.mean(xg, axis=-1, keepdims=True)
    var = jnp.mean((xg - mean) ** 2, axis=-1, keepdims=True)
    y = ((xg - mean) * lax.rsqrt(var + eps)).reshape(N, C, *spatial)
    bshape = (1, C) + (1,) * len(spatial)
    return y * gamma.reshape(bshape) + beta.reshape(bshape)


if __name__ == "__main__":
    # num_groups=16 requires channels divisible by 16.
    N, C, H, W = 2, 32, 16, 16   # S = 256 -> lane-dense tiles

    key = jax.random.PRNGKey(0)
    kx, kg, kb = jax.random.split(key, 3)
    x = jax.random.normal(kx, (N, C, H, W), dtype=jnp.float32)
    gamma = 1.0 + 0.1 * jax.random.normal(kg, (C,), dtype=jnp.float32)
    beta = 0.1 * jax.random.normal(kb, (C,), dtype=jnp.float32)

    out = group_norm_pallas(x, gamma, beta, num_groups=16, eps=1e-6)
    out = jax.block_until_ready(out)

    ref = _reference(x, gamma, beta, num_groups=16, eps=1e-6)
    assert out.shape == x.shape and out.dtype == x.dtype
    max_err = float(jnp.max(jnp.abs(out - ref)))
    assert jnp.allclose(out, ref, atol=1e-4, rtol=1e-4), max_err

    print("KERNEL_OK")
</pallas_src>

<mosaic_0001>
module attributes {stable_mosaic.version = 11 : i64} {
  func.func @_group_norm_kernel(%arg0: i32, %arg1: i32, %arg2: memref<1x16x2x256xf32, #tpu.memory_space<vmem>>, %arg3: memref<16x2x1xf32, #tpu.memory_space<vmem>>, %arg4: memref<16x2x1xf32, #tpu.memory_space<vmem>>, %arg5: memref<1x16x2x256xf32, #tpu.memory_space<vmem>>) attributes {dimension_semantics = [#tpu.dimension_semantics<parallel>, #tpu.dimension_semantics<parallel>], iteration_bounds = array<i64: 2, 1>, scalar_prefetch = 0 : i64, scratch_operands = 0 : i64, tpu.core_type = #tpu.core_type<tc>, window_params = [{transform_indices = @transform_0, window_bounds = array<i64: 1, 16, 2, 256>}, {transform_indices = @transform_1, window_bounds = array<i64: 16, 2, 1>}, {transform_indices = @transform_2, window_bounds = array<i64: 16, 2, 1>}, {transform_indices = @transform_3, window_bounds = array<i64: 1, 16, 2, 256>}]} {
    %c0 = arith.constant 0 : index
    %c0_0 = arith.constant 0 : index
    %c0_1 = arith.constant 0 : index
    %c0_2 = arith.constant 0 : index
    %0 = vector.load %arg2[%c0, %c0_0, %c0_1, %c0_2] : memref<1x16x2x256xf32, #tpu.memory_space<vmem>>, vector<1x16x2x256xf32>
    %1 = vector.shape_cast %0 : vector<1x16x2x256xf32> to vector<16x2x256xf32>
    %cst = arith.constant dense<0.000000e+00> : vector<16x2xf32>
    %2 = vector.multi_reduction <add>, %1, %cst [2] : vector<16x2x256xf32> to vector<16x2xf32>
    %3 = vector.shape_cast %2 : vector<16x2xf32> to vector<16x2x1xf32>
    %cst_3 = arith.constant dense<0.000000e+00> : vector<16x1xf32>
    %4 = vector.multi_reduction <add>, %3, %cst_3 [1] : vector<16x2x1xf32> to vector<16x1xf32>
    %5 = vector.shape_cast %4 : vector<16x1xf32> to vector<16x1x1xf32>
    %cst_4 = arith.constant 0.001953125 : f32
    %6 = vector.broadcast %cst_4 : f32 to vector<16x1x1xf32>
    %7 = arith.mulf %5, %6 : vector<16x1x1xf32>
    %8 = vector.broadcast %7 : vector<16x1x1xf32> to vector<16x2x256xf32>
    %9 = arith.subf %1, %8 : vector<16x2x256xf32>
    %10 = arith.mulf %9, %9 : vector<16x2x256xf32>
    %cst_5 = arith.constant dense<0.000000e+00> : vector<16x2xf32>
    %11 = vector.multi_reduction <add>, %10, %cst_5 [2] : vector<16x2x256xf32> to vector<16x2xf32>
    %12 = vector.shape_cast %11 : vector<16x2xf32> to vector<16x2x1xf32>
    %cst_6 = arith.constant dense<0.000000e+00> : vector<16x1xf32>
    %13 = vector.multi_reduction <add>, %12, %cst_6 [1] : vector<16x2x1xf32> to vector<16x1xf32>
    %14 = vector.shape_cast %13 : vector<16x1xf32> to vector<16x1x1xf32>
    %cst_7 = arith.constant 0.001953125 : f32
    %15 = vector.broadcast %cst_7 : f32 to vector<16x1x1xf32>
    %16 = arith.mulf %14, %15 : vector<16x1x1xf32>
    %cst_8 = arith.constant 9.99999997E-7 : f32
    %17 = vector.broadcast %cst_8 : f32 to vector<16x1x1xf32>
    %18 = arith.addf %16, %17 : vector<16x1x1xf32>
    %19 = math.rsqrt %18 : vector<16x1x1xf32>
    %c0_9 = arith.constant 0 : index
    %c0_10 = arith.constant 0 : index
    %c0_11 = arith.constant 0 : index
    %20 = vector.load %arg3[%c0_9, %c0_10, %c0_11] : memref<16x2x1xf32, #tpu.memory_space<vmem>>, vector<16x2x1xf32>
    %21 = vector.broadcast %19 : vector<16x1x1xf32> to vector<16x2x1xf32>
    %22 = arith.mulf %20, %21 : vector<16x2x1xf32>
    %23 = vector.broadcast %22 : vector<16x2x1xf32> to vector<16x2x256xf32>
    %24 = arith.mulf %9, %23 : vector<16x2x256xf32>
    %c0_12 = arith.constant 0 : index
    %c0_13 = arith.constant 0 : index
    %c0_14 = arith.constant 0 : index
    %25 = vector.load %arg4[%c0_12, %c0_13, %c0_14] : memref<16x2x1xf32, #tpu.memory_space<vmem>>, vector<16x2x1xf32>
    %26 = vector.broadcast %25 : vector<16x2x1xf32> to vector<16x2x256xf32>
    %27 = arith.addf %24, %26 : vector<16x2x256xf32>
    %c0_15 = arith.constant 0 : index
    %c0_16 = arith.constant 0 : index
    %c0_17 = arith.constant 0 : index
    %c0_18 = arith.constant 0 : index
    %28 = vector.load %arg5[%c0_15, %c0_16, %c0_17, %c0_18] : memref<1x16x2x256xf32, #tpu.memory_space<vmem>>, vector<1x16x2x256xf32>
    %29 = vector.shape_cast %28 : vector<1x16x2x256xf32> to vector<16x2x256xf32>
    %30 = vector.shape_cast %27 : vector<16x2x256xf32> to vector<1x16x2x256xf32>
    tpu.vector_store %arg5[%c0_15, %c0_16, %c0_17, %c0_18], %30 {strides = array<i32>} : memref<1x16x2x256xf32, #tpu.memory_space<vmem>>, vector<1x16x2x256xf32>,
    return
  }
  func.func @transform_0(%arg0: i32, %arg1: i32) -> (i32, i32, i32, i32) {
    %c0_i32 = arith.constant 0 : i32
    %c0_i32_0 = arith.constant 0 : i32
    %c0_i32_1 = arith.constant 0 : i32
    return %arg0, %arg1, %c0_i32, %c0_i32_0 : i32, i32, i32, i32
  }
  func.func @transform_1(%arg0: i32, %arg1: i32) -> (i32, i32, i32) {
    %c0_i32 = arith.constant 0 : i32
    %c0_i32_0 = arith.constant 0 : i32
    %c0_i32_1 = arith.constant 0 : i32
    return %arg1, %c0_i32, %c0_i32_0 : i32, i32, i32
  }
  func.func @transform_2(%arg0: i32, %arg1: i32) -> (i32, i32, i32) {
    %c0_i32 = arith.constant 0 : i32
    %c0_i32_0 = arith.constant 0 : i32
    %c0_i32_1 = arith.constant 0 : i32
    return %arg1, %c0_i32, %c0_i32_0 : i32, i32, i32
  }
  func.func @transform_3(%arg0: i32, %arg1: i32) -> (i32, i32, i32, i32) {
    %c0_i32 = arith.constant 0 : i32
    %c0_i32_0 = arith.constant 0 : i32
    %c0_i32_1 = arith.constant 0 : i32
    return %arg0, %arg1, %c0_i32, %c0_i32_0 : i32, i32, i32, i32
  }
}

</mosaic_0001>

<bundles_post_ra>
// kernel: tpu_custom_call.1
= control target key start
LH: loop header
LB: loop body
LE: loop exit
PB: predicated region body
PF: predicated region fallthrough
CT: control target
= control target key end

     0   :  { %8 = vsyncpa [#allocation3], 0  ;;  %s2512_s0 = inlined_call_operand.hbm [shape: f32[2,16,2,256], index: 0, kind: input, shape index: {}]   ;;  %s2513_s1 = inlined_call_operand.vmem [shape: f32[16,2,1], index: 1, kind: input, shape index: {}]   ;;  %s2514_s2 = inlined_call_operand.vmem [shape: f32[16,2,1], index: 2, kind: input, shape index: {}]   ;;  %s2515_s3 = inlined_call_operand.hbm [shape: f32[2,16,2,256], index: 3, kind: output, shape index: {}]  }
   0x1   :  { %10 = vsyncpa [#allocation3 + $0x1], 0 }
   0x2   :  { %11 = vsyncpa [#allocation4], 0 }
   0x3   :  { %13 = vsyncpa [#allocation4 + $0x1], 0  ;;  %s1873_s12 = smov 0   ;;  %s1875_s13 = smov 0  }
   0x4   :  { %s1877_s14 = smov 0   ;;  %s1879_s15 = smov 0  }
   0x5   :  { %s1881_s16 = smov 0   ;;  %s1883_s17 = smov 0  }
   0x6 LB: > { %s1611_s18 = sadd.s32 4294967295, %s1845_s17   ;;  %s1612_s19 = sadd.s32 4294967294, %s1845_s17   ;;  %s1845_s17 = sphi %s1883_s17, %s19_s17   ;;  %s1841_s16 = sphi %s1881_s16, %s2524_s16   ;;  %s1837_s15 = sphi %s1879_s15, %s2523_s15   ;;  %s1833_s14 = sphi %s1877_s14, %s2522_s14   ;;  %s1829_s13 = sphi %s1875_s13, %s2521_s13   ;;  %s1825_s12 = sphi %s1873_s12, %s2520_s12  }
   0x7   : > { %s31_s20 = sadd.s32 1, %s1841_s16  ;;  %s40_s21 = sadd.s32 1, %s1833_s14 }
   0x8   : > { %p33_p0 = scmp.ge.s32.totalorder %s31_s20, 2  ;;  %p47_p1 = scmp.ne.s32.totalorder %s1833_s14, %s1829_s13 }
   0x9   : > { %p48_p2 = scmp.eq.s32.totalorder %s1845_s17, 0  ;;  %p53_p3 = scmp.ne.s32.totalorder %s1829_s13, %s1825_s12 }
   0xa   : > { %s2526_s20 = smov (%p33_p0, %s31_s20), 0  ;;  %p54_p5 = scmp.eq.s32.totalorder %s1611_s18, 0 }
   0xb   : > { %p1914_p4 = por %p48_p2, %p47_p1  ;;  %s35_s23 = ssub.s32 %s1841_s16, %s2526_s20 }
   0xc   : > { %p131_p6 = scmp.eq.s32.totalorder %s1611_s18, 1  ;;  %p38_p7 = scmp.eq.s32.totalorder %s35_s23, 0 }
   0xd   : > { %p1920_p8 = por %p54_p5, %p53_p3  ;;  %p137_p10 = scmp.eq.s32.totalorder %s1612_s19, 1 }
   0xe   : > { %p1924_p9 = por %p131_p6, %p47_p1  ;;  %p1616_p12 = scmp.ge.s32.totalorder %s1845_s17, 2 }
   0xf   : > { %s1929_s26 = scalar_select %p38_p7, %s1833_s14, %s40_s21  }
  0x10   : > { %p1931_p11 = por %p137_p10, %p53_p3  ;;  %p1642_p13 = scmp.lt.s32.totalorder %s1845_s17, 2 }
  0x11   : > { %s175_s28 = sand.u32 1, %s1833_s14   ;;  %s1628_s30 = sshll.u32 %s1841_s16, 6 }
  0x12   : > { %s1617_s29 = sshll.u32 %s175_s28, 6  ;;  %s187_s6 = scalar_lea.hbm %s2512_s0, %s1628_s30 }
  0x13   : > { %s179_s7 = scalar_lea.vmem [#allocation2], %s1617_s29  ;;  %s188_s9 = sshll.u32 %s187_s6, 4  ;;  %s189_s9 = int_to_ptr.hbm [resolvable:$true] %s188_s9 }
  0x14   : > { %s190_s8 = sshll.u32 %s179_s7, 4  ;;  %p1635_p0 = pnand %p1642_p13, %p1914_p4  ;;  %s191_s8 = int_to_ptr.vmem [resolvable:$true] %s190_s8 }
  0x15   : > { %p1620_p1 = scmp.ge.s32.totalorder %s1845_s17, 1  ;;  %s176_s10 = scalar_lea.sflag [#allocation3], %s175_s28 }
  0x16   : > { %s1847_s11 = smov 64   ;;  %s1848_s18 = smov 4  }
  0x17   : > { %1637 = dma.hbm_to_vmem [thread:$0]  (!%p1635_p0), %s189_s9, 1024, %s191_s8, %s176_s10, %s1847_s11, %s1847_s11, %s1848_s18  }
  0x18   : > { %p198_p2 = scmp.lt.s32.totalorder %s1845_s17, 3 }
  0x1a   : > { %p199_p3 = pnand %p1620_p1, %p198_p2 }
  0x1b   : > { %s1947_s19 = sand.u32 (!%p199_p3), 1, %s1829_s13  }
  0x1c   : > { %202 = sbr.rel (%p199_p3) target bundleno = 655 (0x28f), region = 32  ;;  %s1621_s21 = sshll.u32 (!%p199_p3), %s1947_s19, 6 }
  0x1d   : > { %s205_s23 = scalar_lea.sflag (!%p199_p3), [#allocation3], %s1947_s19  ;;  %s1953_s22 = scalar_lea.vmem (!%p199_p3), [#allocation2], %s1621_s21 }
  0x21   : > { %1816 = dma.done.wait (%p1920_p8), %s205_s23, 1024  }
  0x22   : > { %1818 = vsyncadd (%p1920_p8), %s205_s23, 4294966272  ;;  %v1849_v0 = vmov 0   ;;  %v1285_v1 = vld [vmem:[%s2514_s2 + $0x4] sm:$0x3]  ;;  %v1284_v2 = vld [vmem:[%s2514_s2 + $0x2] sm:$0x3] }
  0x23   : > { %1700 = vset.pattern.permute.xlu2 %v1849_v0  ;;  %1699 = vset.pattern.permute.xlu0 %v1849_v0  ;;  %v1283_v3 = vld [vmem:[%s2514_s2] sm:$0x3]  ;;  %v1969_v4 = vld [vmem:[%s1953_s22] sm:$0xf]  ;;  %v1973_v5 = vld [vmem:[%s1953_s22 + $0x4] sm:$0xf] }
  0x24   : > { %1698 = vset.pattern.permute.xlu1 %v1849_v0  ;;  %1309 = vperm.xlu2 %1700, %v1285_v1   ;;  %288 = vst [vmem:[#allocation1] ss:$4 sm:$0xff] %v1969_v4  ;;  %v1288_v6 = vld [vmem:[%s2514_s2 + $0xa] sm:$0x3]  ;;  %v1286_v7 = vld [vmem:[%s2514_s2 + $0x6] sm:$0x3] }
  0x25   : > { %1305 = vperm.xlu0 %1699, %v1284_v2   ;;  %1301 = vperm.xlu1 %1698, %v1283_v3   ;;  %292 = vst [vmem:[#allocation1 + $0x20] ss:$4 sm:$0xff] %v1973_v5  ;;  %v1983_v8 = vld [vmem:[%s1953_s22 + $0x8] sm:$0xf]  ;;  %v1986_v9 = vld [vmem:[%s1953_s22 + $0xc] sm:$0xf] }
  0x26   : > { %v1991_v14 = vld [vmem:[%s1953_s22 + $0x10] sm:$0xf]  ;;  %v1994_v15 = vld [vmem:[%s1953_s22 + $0x14] sm:$0xf]  ;;  %v1999_v20 = vld [vmem:[%s1953_s22 + $0x18] sm:$0xf] }
  0x27   : > { %v2002_v21 = vld [vmem:[%s1953_s22 + $0x1c] sm:$0xf]  ;;  %v2007_v26 = vld [vmem:[%s1953_s22 + $0x20] sm:$0xf]  ;;  %vm369_vm0 = vcmask 1041408   ;;  %s2389_s29 = scalar_lea.vmem [#allocation5], %s1621_s21 }
  0x28   : > { %v2010_v27 = vld [vmem:[%s1953_s22 + $0x24] sm:$0xf]  ;;  %v2025_v35 = vld [vmem:[%s1953_s22 + $0x28] sm:$0xf]  ;;  %v2028_v36 = vld [vmem:[%s1953_s22 + $0x2c] sm:$0xf] }
  0x29   : > { %v2039_v49 = vld [vmem:[%s1953_s22 + $0x30] sm:$0xf]  ;;  %v2042_v51 = vld [vmem:[%s1953_s22 + $0x34] sm:$0xf]  ;;  %v2051_v61 = vld [vmem:[%s1953_s22 + $0x38] sm:$0xf] }
  0x2a   : > { %s1629_s5 = sshll.u32 %s1837_s15, 6  ;;  %s1491_s8 = sshll.u32 %s2389_s29, 4  ;;  %s1492_s8 = int_to_ptr.vmem [resolvable:$true] %s1491_s8 }
  0x2b   : > { %v289_v10 = vld.sshfl [vmem:[#allocation1] sm:$0xff pattern:$0x73625140]  ;;  %v290_v11 = vld.sshfl [vmem:[#allocation1 + $0x8] sm:$0xff pattern:$0x73625140]  ;;  %s1490_s7 = scalar_lea.hbm %s2515_s3, %s1629_s5 }
  0x2c   : > { %1321 = vperm.xlu2 %1700, %v1288_v6   ;;  %295 = vst [vmem:[#allocation1] ss:$4 sm:$0xff] %v1983_v8  ;;  %v293_v12 = vld.sshfl [vmem:[#allocation1 + $0x20] sm:$0xff pattern:$0x73625140]  ;;  %v370_v32 = vsel %vm369_vm0, %v289_v10, 0.0 }
  0x2d   : > { %1313 = vperm.xlu1 %1698, %v1286_v7   ;;  %v294_v13 = vld.sshfl [vmem:[#allocation1 + $0x28] sm:$0xff pattern:$0x73625140]  ;;  %v371_v33 = vsel %vm369_vm0, %v290_v11, 0.0  ;;  %v375_v43 = vsel %vm369_vm0, %v293_v12, 0.0  ;;  %s1493_s9 = sshll.u32 %s1490_s7, 4  ;;  %s1494_s9 = int_to_ptr.hbm [resolvable:$true] %s1493_s9 }
  0x2e   : > { %298 = vst [vmem:[#allocation1 + $0x20] ss:$4 sm:$0xff] %v1986_v9  ;;  %v372_v34 = vadd.f32 %v371_v33, %v370_v32  ;;  %v376_v44 = vsel %vm369_vm0, %v294_v13, 0.0  ;;  %v1287_v10 = vld [vmem:[%s2514_s2 + $0x8] sm:$0x3]  ;;  %s1476_s15 = scalar_lea.sflag [#allocation4], %s1947_s19 }
  0x2f   : > { %v377_v48 = vadd.f32 %v376_v44, %v375_v43  ;;  %s1777_s10 = sshra.s32 %s1494_s9, 4  ;;  %s1783_s28 = scalar_lea.hbm %s2515_s3, 128  ;;  %s1778_s10 = int_to_ptr.hbm [resolvable:$true] %s1777_s10 }
  0x30   : > { %s1779_s11 = scalar_lea.hbm %s1778_s10, 64  ;;  %p1784_p7 = scmp.lt.s32.totalorder %s1778_s10, %s2515_s3 }
  0x31   : > { %p1780_p4 = scmp.ne.s32.totalorder %s1778_s10, %s1779_s11  ;;  %p1785_p8 = scmp.lt.s32.totalorder %s1783_s28, %s1779_s11 }
  0x33   : > { %v296_v16 = vld.sshfl [vmem:[#allocation1] sm:$0xff pattern:$0x73625140]  ;;  %v297_v17 = vld.sshfl [vmem:[#allocation1 + $0x8] sm:$0xff pattern:$0x73625140]  ;;  %p1781_p5 = pnand %p1780_p4, %p1924_p9  ;;  %p1786_p10 = por %p1785_p8, %p1784_p7 }
  0x34   : > { %301 = vst [vmem:[#allocation1] ss:$4 sm:$0xff] %v1991_v14  ;;  %v380_v45 = vsel %vm369_vm0, %v296_v16, 0.0  ;;  %v381_v46 = vsel %vm369_vm0, %v297_v17, 0.0 }
  0x35   : > { %v299_v18 = vld.sshfl [vmem:[#allocation1 + $0x20] sm:$0xff pattern:$0x73625140]  ;;  %v300_v19 = vld.sshfl [vmem:[#allocation1 + $0x28] sm:$0xff pattern:$0x73625140]  ;;  %v382_v50 = vadd.f32 %v381_v46, %v380_v45  ;;  %p1782_p6 = pneg %p1781_p5 }
  0x36   : > { %304 = vst [vmem:[#allocation1 + $0x20] ss:$4 sm:$0xff] %v1994_v15  ;;  %v385_v58 = vsel %vm369_vm0, %v299_v18, 0.0  ;;  %v386_v59 = vsel %vm369_vm0, %v300_v19, 0.0  ;;  %v1289_v19 = vld [vmem:[%s2514_s2 + $0xc] sm:$0x3] }
  0x37   : > { %v387_v62 = vadd.f32 %v386_v59, %v385_v58  ;;  %v1290_v58 = vld [vmem:[%s2514_s2 + $0xe] sm:$0x3]  ;;  %p1787_p13 = pnand %p1786_p10, %p1782_p6 }
  0x3b   : > { %v302_v22 = vld.sshfl [vmem:[#allocation1] sm:$0xff pattern:$0x73625140]  ;;  %v303_v23 = vld.sshfl [vmem:[#allocation1 + $0x8] sm:$0xff pattern:$0x73625140] }
  0x3c   : > { %307 = vst [vmem:[#allocation1] ss:$4 sm:$0xff] %v1999_v20  ;;  %v390_v39 = vsel %vm369_vm0, %v302_v22, 0.0  ;;  %v391_v40 = vsel %vm369_vm0, %v303_v23, 0.0 }
  0x3d   : > { %v305_v24 = vld.sshfl [vmem:[#allocation1 + $0x20] sm:$0xff pattern:$0x73625140]  ;;  %v306_v25 = vld.sshfl [vmem:[#allocation1 + $0x28] sm:$0xff pattern:$0x73625140]  ;;  %v392_v47 = vadd.f32 %v391_v40, %v390_v39 }
  0x3e   : > { %310 = vst [vmem:[#allocation1 + $0x20] ss:$4 sm:$0xff] %v2002_v21  ;;  %v395_v54 = vsel %vm369_vm0, %v305_v24, 0.0  ;;  %v396_v55 = vsel %vm369_vm0, %v306_v25, 0.0  ;;  %v2067_v24 = vld [vmem:[%s1953_s22 + $0x3c] sm:$0xf] }
  0x3f   : > { %v397_v60 = vadd.f32 %v396_v55, %v395_v54  ;;  %v1291_v25 = vld [vmem:[%s2514_s2 + $0x10] sm:$0x3] }
  0x43   : > { %v2012_v28 = vld.sshfl [vmem:[#allocation1] sm:$0xff pattern:$0x73625140]  ;;  %v2014_v29 = vld.sshfl [vmem:[#allocation1 + $0x8] sm:$0xff pattern:$0x73625140] }
  0x44   : > { %313 = vst [vmem:[#allocation1] ss:$4 sm:$0xff] %v2007_v26  ;;  %v400_v32 = vsel %vm369_vm0, %v2012_v28, 0.0  ;;  %v401_v33 = vsel %vm369_vm0, %v2014_v29, 0.0 }
  0x45   : > { %v2017_v30 = vld.sshfl [vmem:[#allocation1 + $0x20] sm:$0xff pattern:$0x73625140]  ;;  %v2019_v31 = vld.sshfl [vmem:[#allocation1 + $0x28] sm:$0xff pattern:$0x73625140] }
  0x46   : > { %316 = vst [vmem:[#allocation1 + $0x20] ss:$4 sm:$0xff] %v2010_v27  ;;  %v405_v40 = vsel %vm369_vm0, %v2017_v30, 0.0  ;;  %v406_v43 = vsel %vm369_vm0, %v2019_v31, 0.0 }
  0x47   : > { %v407_v45 = vadd.f32 %v406_v43, %v405_v40 }
  0x4b   : > { %v314_v37 = vld.sshfl [vmem:[#allocation1] sm:$0xff pattern:$0x73625140]  ;;  %v315_v38 = vld.sshfl [vmem:[#allocation1 + $0x8] sm:$0xff pattern:$0x73625140] }
  0x4c   : > { %319 = vst [vmem:[#allocation1] ss:$4 sm:$0xff] %v2025_v35  ;;  %v410_v1 = vsel %vm369_vm0, %v314_v37, 0.0  ;;  %v411_v2 = vsel %vm369_vm0, %v315_v38, 0.0 }
  0x4d   : > { %v317_v41 = vld.sshfl [vmem:[#allocation1 + $0x20] sm:$0xff pattern:$0x73625140]  ;;  %v318_v42 = vld.sshfl [vmem:[#allocation1 + $0x28] sm:$0xff pattern:$0x73625140]  ;;  %v412_v3 = vadd.f32 %v411_v2, %v410_v1 }
  0x4e   : > { %322 = vst [vmem:[#allocation1 + $0x20] ss:$4 sm:$0xff] %v2028_v36  ;;  %v415_v37 = vsel %vm369_vm0, %v317_v41, 0.0  ;;  %v416_v38 = vsel %vm369_vm0, %v318_v42, 0.0 }
  0x4f   : > { %373 = vadd.xlane.f32.xlu0 %v372_v34  ;;  %v402_v34 = vadd.f32 %v401_v33, %v400_v32  ;;  %v417_v39 = vadd.f32 %v416_v38, %v415_v37 }
  0x53   : > { %v320_v52 = vld.sshfl [vmem:[#allocation1] sm:$0xff pattern:$0x73625140]  ;;  %v321_v53 = vld.sshfl [vmem:[#allocation1 + $0x8] sm:$0xff pattern:$0x73625140] }
  0x54   : > { %325 = vst [vmem:[#allocation1] ss:$4 sm:$0xff] %v2039_v49  ;;  %v420_v41 = vsel %vm369_vm0, %v320_v52, 0.0  ;;  %v421_v42 = vsel %vm369_vm0, %v321_v53, 0.0 }
  0x55   : > { %393 = vadd.xlane.f32.xlu2 %v392_v47  ;;  %v323_v56 = vld.sshfl [vmem:[#allocation1 + $0x20] sm:$0xff pattern:$0x73625140]  ;;  %v324_v57 = vld.sshfl [vmem:[#allocation1 + $0x28] sm:$0xff pattern:$0x73625140]  ;;  %v422_v31 = vadd.f32 %v421_v42, %v420_v41 }
  0x56   : > { %328 = vst [vmem:[#allocation1 + $0x20] ss:$4 sm:$0xff] %v2042_v51  ;;  %v425_v6 = vsel %vm369_vm0, %v323_v56, 0.0  ;;  %v426_v7 = vsel %vm369_vm0, %v324_v57, 0.0 }
  0x57   : > { %378 = vadd.xlane.f32.xlu0 %v377_v48  ;;  %383 = vadd.xlane.f32.xlu1 %v382_v50  ;;  %v427_v11 = vadd.f32 %v426_v7, %v425_v6  ;;  %v1292_v6 = vld [vmem:[%s2514_s2 + $0x12] sm:$0x3] }
  0x5b   : > { %v326_v63 = vld.sshfl [vmem:[#allocation1] sm:$0xff pattern:$0x73625140]  ;;  %v327_v0 = vld.sshfl [vmem:[#allocation1 + $0x8] sm:$0xff pattern:$0x73625140] }
  0x5c   : > { %331 = vst [vmem:[#allocation1] ss:$4 sm:$0xff] %v2051_v61  ;;  %v430_v44 = vsel %vm369_vm0, %v326_v63, 0.0  ;;  %v431_v28 = vsel %vm369_vm0, %v327_v0, 0.0 }
  0x5d   : > { %398 = vadd.xlane.f32.xlu2 %v397_v60  ;;  %v329_v22 = vld.sshfl [vmem:[#allocation1 + $0x20] sm:$0xff pattern:$0x73625140]  ;;  %v330_v23 = vld.sshfl [vmem:[#allocation1 + $0x28] sm:$0xff pattern:$0x73625140]  ;;  %v432_v29 = vadd.f32 %v431_v28, %v430_v44 }
  0x5e   : > { %334 = vst [vmem:[#allocation1 + $0x20] ss:$4 sm:$0xff] %v2067_v24  ;;  %v435_v54 = vsel %vm369_vm0, %v329_v22, 0.0  ;;  %v436_v55 = vsel %vm369_vm0, %v330_v23, 0.0 }
  0x5f   : > { %388 = vadd.xlane.f32.xlu1 %v387_v62  ;;  %v437_v56 = vadd.f32 %v436_v55, %v435_v54 }
  0x63   : > { %v332_v12 = vld.sshfl [vmem:[#allocation1] sm:$0xff pattern:$0x73625140]  ;;  %v333_v13 = vld.sshfl [vmem:[#allocation1 + $0x8] sm:$0xff pattern:$0x73625140] }
  0x64   : > { %v440_v16 = vsel %vm369_vm0, %v332_v12, 0.0  ;;  %v441_v17 = vsel %vm369_vm0, %v333_v13, 0.0 }
  0x65   : > { %413 = vadd.xlane.f32.xlu2 %v412_v3  ;;  %v442_v18 = vadd.f32 %v441_v17, %v440_v16  ;;  %v335_v46 = vld.sshfl [vmem:[#allocation1 + $0x20] sm:$0xff pattern:$0x73625140]  ;;  %v336_v47 = vld.sshfl [vmem:[#allocation1 + $0x28] sm:$0xff pattern:$0x73625140] }
  0x66   : > { %v445_v30 = vsel %vm369_vm0, %v335_v46, 0.0  ;;  %v446_v48 = vsel %vm369_vm0, %v336_v47, 0.0 }
  0x67   : > { %v447_v50 = vadd.f32 %v446_v48, %v445_v30 }
  0x6b   : > { %1317 = vperm.xlu0 %1699, %v1287_v10  }
  0x6d   : > { %428 = vadd.xlane.f32.xlu2 %v427_v11 }
  0x75   : > { %443 = vadd.xlane.f32.xlu2 %v442_v18 }
  0x78   : > { %1325 = vperm.xlu1 %1698, %v1289_v19  }
  0x7e   : > { %v2091_v57 = vpop.permute.xlu2 %1309 }
  0x86   : > { %v2100_v59 = vpop.permute.xlu2 %1321 }
  0x8d   : > { %1333 = vperm.xlu2 %1700, %v1291_v25  }
  0x95   : > { %403 = vadd.xlane.f32.xlu0 %v402_v34 }
  0x97   : > { %v2093_v52 = vpop.permute.xlu1 %1301  ;;  %v2095_v53 = vpop.permute.xlu0 %1305 }
  0x9d   : > { %418 = vadd.xlane.f32.xlu0 %v417_v39 }
  0x9f   : > { %v2102_v62 = vpop.permute.xlu1 %1313 }
  0xa2   : > { %408 = vadd.xlane.f32.xlu1 %v407_v45 }
  0xa5   : > { %433 = vadd.xlane.f32.xlu0 %v432_v29 }
  0xaa   : > { %423 = vadd.xlane.f32.xlu1 %v422_v31 }
  0xad   : > { %448 = vadd.xlane.f32.xlu0 %v447_v50 }
  0xb2   : > { %438 = vadd.xlane.f32.xlu1 %v437_v56 }
  0xc1   : > { %1329 = vperm.xlu0 %1699, %v1290_v58  }
  0xc2   : > { %v374_v60 = vpop.xlane.xlu0 %373 }
  0xc3   : > { %v450_v63 = vsel %vm369_vm0, %v374_v60, 0.0 }
  0xc4   : > { %v451_v0 = vrot.slane %v450_v63, 4 }
  0xc6   : > { %v452_v1 = vadd.f32 %v451_v0, %v450_v63 }
  0xc8   : > { %v453_v2 = vrot.slane %v452_v1, 2  ;;  %v394_v3 = vpop.xlane.xlu2 %393 }
  0xc9   : > { %v478_v10 = vsel %vm369_vm0, %v394_v3, 0.0 }
  0xca   : > { %v454_v7 = vadd.f32 %v453_v2, %v452_v1  ;;  %v379_v11 = vpop.xlane.xlu0 %378  ;;  %v479_v12 = vrot.slane %v478_v10, 4  ;;  %v384_v16 = vpop.xlane.xlu1 %383 }
  0xcb   : > { %v457_v13 = vsel %vm369_vm0, %v379_v11, 0.0  ;;  %v464_v19 = vsel %vm369_vm0, %v384_v16, 0.0  ;;  %1337 = vperm.xlu1 %1698, %v1292_v6  }
  0xcc   : > { %v455_v17 = vrot.slane %v454_v7, 1  ;;  %v458_v18 = vrot.slane %v457_v13, 4  ;;  %v480_v22 = vadd.f32 %v479_v12, %v478_v10  ;;  %v465_v23 = vrot.slane %v464_v19, 4 }
  0xce   : > { %v456_v25 = vadd.f32 %v455_v17, %v454_v7  ;;  %v459_v32 = vadd.f32 %v458_v18, %v457_v13  ;;  %v481_v33 = vrot.slane %v480_v22, 2  ;;  %v466_v34 = vadd.f32 %v465_v23, %v464_v19 }
  0xd0   : > { %v562_v37 = vmul.f32 0.001953125, %v456_v25  ;;  %v460_v38 = vrot.slane %v459_v32, 2  ;;  %v482_v39 = vadd.f32 %v481_v33, %v480_v22  ;;  %v467_v40 = vrot.slane %v466_v34, 2  ;;  %v399_v43 = vpop.xlane.xlu2 %398 }
  0xd1   : > { %v485_v45 = vsel %vm369_vm0, %v399_v43, 0.0 }
  0xd2   : > { %v2112_v44 = vsub.f32 %v1969_v4, %v562_v37  ;;  %v461_v28 = vadd.f32 %v460_v38, %v459_v32  ;;  %v468_v29 = vadd.f32 %v467_v40, %v466_v34  ;;  %v486_v46 = vrot.slane %v485_v45, 4  ;;  %v389_v47 = vpop.xlane.xlu1 %388 }
  0xd3   : > { %v483_v42 = vrot.slane %v482_v39, 1  ;;  %v471_v48 = vsel %vm369_vm0, %v389_v47, 0.0 }
  0xd4   : > { %v594_v41 = vmul.f32 %v2112_v44, %v2112_v44  ;;  %v462_v30 = vrot.slane %v461_v28, 1  ;;  %v469_v31 = vrot.slane %v468_v29, 1  ;;  %v487_v50 = vadd.f32 %v486_v46, %v485_v45 }
  0xd5   : > { %v472_v54 = vrot.slane %v471_v48, 4  ;;  %v484_v60 = vadd.f32 %v483_v42, %v482_v39 }
  0xd6   : > { %626 = vst [vmem:[#allocation1] ss:$4 sm:$0xff] %v594_v41  ;;  %v463_v55 = vadd.f32 %v462_v30, %v461_v28  ;;  %v470_v4 = vadd.f32 %v469_v31, %v468_v29  ;;  %v488_v56 = vrot.slane %v487_v50, 2 }
  0xd7   : > { %v473_v58 = vadd.f32 %v472_v54, %v471_v48  ;;  %v566_v11 = vmul.f32 0.001953125, %v484_v60 }
  0xd8   : > { %v563_v63 = vmul.f32 0.001953125, %v463_v55  ;;  %v564_v0 = vmul.f32 0.001953125, %v470_v4  ;;  %v489_v1 = vadd.f32 %v488_v56, %v487_v50 }
  0xd9   : > { %v474_v2 = vrot.slane %v473_v58, 2 }
  0xda   : > { %v2119_v3 = vsub.f32 %v1973_v5, %v563_v63  ;;  %v2122_v6 = vsub.f32 %v1983_v8, %v564_v0  ;;  %v490_v7 = vrot.slane %v489_v1, 1  ;;  %v2129_v5 = vsub.f32 %v1991_v14, %v566_v11 }
  0xdb   : > { %v475_v10 = vadd.f32 %v474_v2, %v473_v58  ;;  %v414_v2 = vpop.xlane.xlu2 %413 }
  0xdc   : > { %v595_v12 = vmul.f32 %v2119_v3, %v2119_v3  ;;  %v596_v13 = vmul.f32 %v2122_v6, %v2122_v6  ;;  %v491_v19 = vadd.f32 %v490_v7, %v489_v1  ;;  %v598_v32 = vmul.f32 %v2129_v5, %v2129_v5 }
  0xdd   : > { %v476_v16 = vrot.slane %v475_v10, 1  ;;  %v627_v17 = vld.sshfl [vmem:[#allocation1] sm:$0xff pattern:$0x73625140] }
  0xde   : > { %630 = vst [vmem:[#allocation1 + $0x20] ss:$4 sm:$0xff] %v595_v12  ;;  %v628_v18 = vld.sshfl [vmem:[#allocation1 + $0x8] sm:$0xff pattern:$0x73625140]  ;;  %v567_v23 = vmul.f32 0.001953125, %v491_v19  ;;  %v2156_v12 = vpop.permute.xlu0 %1317 }
  0xdf   : > { %v477_v22 = vadd.f32 %v476_v16, %v475_v10  ;;  %633 = vst [vmem:[#allocation1] ss:$4 sm:$0xff] %v596_v13  ;;  %v707_v30 = vsel %vm369_vm0, %v627_v17, 0.0  ;;  %v708_v48 = vsel %vm369_vm0, %v628_v18, 0.0  ;;  %v506_v10 = vsel %vm369_vm0, %v414_v2, 0.0 }
  0xe0   : > { %v2141_v14 = vsub.f32 %v1994_v15, %v567_v23  ;;  %v709_v55 = vadd.f32 %v708_v48, %v707_v30  ;;  %v507_v11 = vrot.slane %v506_v10, 4 }
  0xe1   : > { %v565_v8 = vmul.f32 0.001953125, %v477_v22 }
  0xe2   : > { %v599_v46 = vmul.f32 %v2141_v14, %v2141_v14  ;;  %v508_v13 = vadd.f32 %v507_v11, %v506_v10 }
  0xe3   : > { %v2132_v25 = vsub.f32 %v1986_v9, %v565_v8 }
  0xe4   : > { %v509_v16 = vrot.slane %v508_v13, 2 }
  0xe5   : > { %v597_v33 = vmul.f32 %v2132_v25, %v2132_v25  ;;  %v631_v34 = vld.sshfl [vmem:[#allocation1 + $0x20] sm:$0xff pattern:$0x73625140]  ;;  %v632_v37 = vld.sshfl [vmem:[#allocation1 + $0x28] sm:$0xff pattern:$0x73625140] }
  0xe6   : > { %v712_v38 = vsel %vm369_vm0, %v631_v34, 0.0  ;;  %v713_v39 = vsel %vm369_vm0, %v632_v37, 0.0  ;;  %v634_v40 = vld.sshfl [vmem:[#allocation1] sm:$0xff pattern:$0x73625140]  ;;  %v510_v22 = vadd.f32 %v509_v16, %v508_v13 }
  0xe7   : > { %v714_v43 = vadd.f32 %v713_v39, %v712_v38  ;;  %636 = vst [vmem:[#allocation1 + $0x20] ss:$4 sm:$0xff] %v597_v33  ;;  %v635_v9 = vld.sshfl [vmem:[#allocation1 + $0x8] sm:$0xff pattern:$0x73625140]  ;;  %v717_v28 = vsel %vm369_vm0, %v634_v40, 0.0  ;;  %v429_v38 = vpop.xlane.xlu2 %428 }
  0xe8   : > { %v718_v45 = vsel %vm369_vm0, %v635_v9, 0.0  ;;  %639 = vst [vmem:[#allocation1] ss:$4 sm:$0xff] %v598_v32  ;;  %v511_v33 = vrot.slane %v510_v22, 1 }
  0xe9   : > { %715 = vadd.xlane.f32.xlu2 %v714_v43  ;;  %v719_v29 = vadd.f32 %v718_v45, %v717_v28  ;;  %v527_v28 = vsel %vm369_vm0, %v429_v38, 0.0 }
  0xea   : > { %v2159_v23 = vpop.permute.xlu1 %1325  ;;  %v512_v9 = vadd.f32 %v511_v33, %v510_v22 }
  0xeb   : > { %720 = vadd.xlane.f32.xlu0 %v719_v29 }
  0xee   : > { %v637_v47 = vld.sshfl [vmem:[#allocation1 + $0x20] sm:$0xff pattern:$0x73625140]  ;;  %v638_v41 = vld.sshfl [vmem:[#allocation1 + $0x28] sm:$0xff pattern:$0x73625140] }
  0xef   : > { %642 = vst [vmem:[#allocation1 + $0x20] ss:$4 sm:$0xff] %v599_v46  ;;  %v640_v42 = vld.sshfl [vmem:[#allocation1] sm:$0xff pattern:$0x73625140]  ;;  %v722_v0 = vsel %vm369_vm0, %v637_v47, 0.0 }
  0xf0   : > { %v641_v15 = vld.sshfl [vmem:[#allocation1 + $0x8] sm:$0xff pattern:$0x73625140]  ;;  %v727_v31 = vsel %vm369_vm0, %v640_v42, 0.0  ;;  %v723_v1 = vsel %vm369_vm0, %v638_v41, 0.0  ;;  %v528_v41 = vrot.slane %v527_v28, 4 }
  0xf1   : > { %v728_v50 = vsel %vm369_vm0, %v641_v15, 0.0  ;;  %v724_v7 = vadd.f32 %v723_v1, %v722_v0  ;;  %v570_v15 = vmul.f32 0.001953125, %v512_v9 }
  0xf2   : > { %v729_v54 = vadd.f32 %v728_v50, %v727_v31 }
  0xf4   : > { %730 = vadd.xlane.f32.xlu2 %v729_v54 }
  0xf5   : > { %710 = vadd.xlane.f32.xlu1 %v709_v55 }
  0xf6   : > { %v643_v4 = vld.sshfl [vmem:[#allocation1 + $0x20] sm:$0xff pattern:$0x73625140]  ;;  %v644_v56 = vld.sshfl [vmem:[#allocation1 + $0x28] sm:$0xff pattern:$0x73625140] }
  0xf7   : > { %v732_v58 = vsel %vm369_vm0, %v643_v4, 0.0  ;;  %v733_v60 = vsel %vm369_vm0, %v644_v56, 0.0 }
  0xf8   : > { %v734_v63 = vadd.f32 %v733_v60, %v732_v58  ;;  %v529_v58 = vadd.f32 %v528_v41, %v527_v28  ;;  %v444_v60 = vpop.xlane.xlu2 %443 }
  0xf9   : > { %v548_v0 = vsel %vm369_vm0, %v444_v60, 0.0 }
  0xfa   : > { %735 = vadd.xlane.f32.xlu0 %v734_v63  ;;  %v2171_v63 = vsub.f32 %v2007_v26, %v570_v15  ;;  %v530_v11 = vrot.slane %v529_v58, 2  ;;  %v549_v13 = vrot.slane %v548_v0, 4 }
  0xfc   : > { %v550_v38 = vadd.f32 %v549_v13, %v548_v0 }
  0xfd   : > { %725 = vadd.xlane.f32.xlu1 %v724_v7 }
 0x108   : > { %v404_v17 = vpop.xlane.xlu0 %403 }
 0x109   : > { %v492_v18 = vsel %vm369_vm0, %v404_v17, 0.0  ;;  %v602_v17 = vmul.f32 %v2171_v63, %v2171_v63 }
 0x10a   : > { %v493_v19 = vrot.slane %v492_v18, 4 }
 0x10c   : > { %v494_v8 = vadd.f32 %v493_v19, %v492_v18 }
 0x10e   : > { %v495_v32 = vrot.slane %v494_v8, 2 }
 0x110   : > { %v496_v34 = vadd.f32 %v495_v32, %v494_v8  ;;  %v419_v37 = vpop.xlane.xlu0 %418 }
 0x111   : > { %v513_v39 = vsel %vm369_vm0, %v419_v37, 0.0  ;;  %v531_v37 = vadd.f32 %v530_v11, %v529_v58 }
 0x112   : > { %v497_v40 = vrot.slane %v496_v34, 1  ;;  %v514_v43 = vrot.slane %v513_v39, 4 }
 0x114   : > { %v498_v45 = vadd.f32 %v497_v40, %v496_v34  ;;  %v515_v29 = vadd.f32 %v514_v43, %v513_v39 }
 0x115   : > { %v409_v47 = vpop.xlane.xlu1 %408 }
 0x116   : > { %v568_v46 = vmul.f32 0.001953125, %v498_v45  ;;  %v499_v42 = vsel %vm369_vm0, %v409_v47, 0.0  ;;  %v516_v50 = vrot.slane %v515_v29, 2 }
 0x117   : > { %v500_v48 = vrot.slane %v499_v42, 4 }
 0x118   : > { %v2165_v30 = vsub.f32 %v1999_v20, %v568_v46  ;;  %v434_v31 = vpop.xlane.xlu0 %433  ;;  %v517_v1 = vadd.f32 %v516_v50, %v515_v29  ;;  %v551_v50 = vrot.slane %v550_v38, 2 }
 0x119   : > { %v534_v54 = vsel %vm369_vm0, %v434_v31, 0.0  ;;  %v501_v4 = vadd.f32 %v500_v48, %v499_v42  ;;  %v532_v31 = vrot.slane %v531_v37, 1 }
 0x11a   : > { %v600_v55 = vmul.f32 %v2165_v30, %v2165_v30  ;;  %v535_v56 = vrot.slane %v534_v54, 4  ;;  %v518_v22 = vrot.slane %v517_v1, 1 }
 0x11b   : > { %v502_v20 = vrot.slane %v501_v4, 2 }
 0x11c   : > { %645 = vst [vmem:[#allocation1] ss:$4 sm:$0xff] %v600_v55  ;;  %v536_v2 = vadd.f32 %v535_v56, %v534_v54  ;;  %v519_v45 = vadd.f32 %v518_v22, %v517_v1  ;;  %v533_v1 = vadd.f32 %v532_v31, %v531_v37 }
 0x11d   : > { %v503_v7 = vadd.f32 %v502_v20, %v501_v4  ;;  %v424_v10 = vpop.xlane.xlu1 %423 }
 0x11e   : > { %v520_v16 = vsel %vm369_vm0, %v424_v10, 0.0  ;;  %v537_v26 = vrot.slane %v536_v2, 2  ;;  %v571_v58 = vmul.f32 0.001953125, %v519_v45 }
 0x11f   : > { %v504_v18 = vrot.slane %v503_v7, 1  ;;  %v521_v19 = vrot.slane %v520_v16, 4 }
 0x120   : > { %v449_v8 = vpop.xlane.xlu0 %448  ;;  %v538_v29 = vadd.f32 %v537_v26, %v536_v2  ;;  %v552_v2 = vadd.f32 %v551_v50, %v550_v38 }
 0x121   : > { %v505_v32 = vadd.f32 %v504_v18, %v503_v7  ;;  %v522_v33 = vadd.f32 %v521_v19, %v520_v16  ;;  %v555_v34 = vsel %vm369_vm0, %v449_v8, 0.0  ;;  %v2189_v18 = vsub.f32 %v2010_v27, %v571_v58 }
 0x122   : > { %v556_v15 = vrot.slane %v555_v34, 4  ;;  %v539_v60 = vrot.slane %v538_v29, 1 }
 0x123   : > { %v646_v39 = vld.sshfl [vmem:[#allocation1] sm:$0xff pattern:$0x73625140]  ;;  %v647_v40 = vld.sshfl [vmem:[#allocation1 + $0x8] sm:$0xff pattern:$0x73625140] }
 0x124   : > { %v569_v43 = vmul.f32 0.001953125, %v505_v32  ;;  %v523_v9 = vrot.slane %v522_v33, 2  ;;  %v737_v28 = vsel %vm369_vm0, %v646_v39, 0.0  ;;  %651 = vst [vmem:[#allocation1] ss:$4 sm:$0xff] %v602_v17  ;;  %v738_v46 = vsel %vm369_vm0, %v647_v40, 0.0 }
 0x125   : > { %v739_v42 = vadd.f32 %v738_v46, %v737_v28  ;;  %v439_v48 = vpop.xlane.xlu1 %438  ;;  %v540_v19 = vadd.f32 %v539_v60, %v538_v29  ;;  %v603_v39 = vmul.f32 %v2189_v18, %v2189_v18 }
 0x126   : > { %v2181_v47 = vsub.f32 %v2002_v21, %v569_v43  ;;  %v524_v41 = vadd.f32 %v523_v9, %v522_v33  ;;  %v541_v54 = vsel %vm369_vm0, %v439_v48, 0.0  ;;  %v557_v21 = vadd.f32 %v556_v15, %v555_v34 }
 0x127   : > { %740 = vadd.xlane.f32.xlu1 %v739_v42  ;;  %v542_v56 = vrot.slane %v541_v54, 4  ;;  %v573_v33 = vmul.f32 0.001953125, %v533_v1  ;;  %v553_v34 = vrot.slane %v552_v2, 1  ;;  %v574_v40 = vmul.f32 0.001953125, %v540_v19 }
 0x128   : > { %v601_v55 = vmul.f32 %v2181_v47, %v2181_v47  ;;  %v525_v4 = vrot.slane %v524_v41, 1  ;;  %v558_v8 = vrot.slane %v557_v21, 2 }
 0x129   : > { %v543_v20 = vadd.f32 %v542_v56, %v541_v54  ;;  %v2200_v45 = vsub.f32 %v2028_v36, %v573_v33  ;;  %v554_v46 = vadd.f32 %v553_v34, %v552_v2  ;;  %v2204_v42 = vsub.f32 %v2039_v49, %v574_v40 }
 0x12a   : > { %648 = vst [vmem:[#allocation1 + $0x20] ss:$4 sm:$0xff] %v601_v55  ;;  %v526_v0 = vadd.f32 %v525_v4, %v524_v41  ;;  %v559_v43 = vadd.f32 %v558_v8, %v557_v21 }
 0x12b   : > { %v652_v7 = vld.sshfl [vmem:[#allocation1] sm:$0xff pattern:$0x73625140]  ;;  %v653_v10 = vld.sshfl [vmem:[#allocation1 + $0x8] sm:$0xff pattern:$0x73625140]  ;;  %v605_v31 = vmul.f32 %v2200_v45, %v2200_v45  ;;  %v606_v36 = vmul.f32 %v2204_v42, %v2204_v42 }
 0x12c   : > { %v572_v11 = vmul.f32 0.001953125, %v526_v0  ;;  %v544_v13 = vrot.slane %v543_v20, 2  ;;  %v747_v16 = vsel %vm369_vm0, %v652_v7, 0.0  ;;  %v748_v17 = vsel %vm369_vm0, %v653_v10, 0.0 }
 0x12d   : > { %v749_v22 = vadd.f32 %v748_v17, %v747_v16  ;;  %v560_v15 = vrot.slane %v559_v43, 1  ;;  %v576_v50 = vmul.f32 0.001953125, %v554_v46 }
 0x12e   : > { %v2192_v26 = vsub.f32 %v2025_v35, %v572_v11  ;;  %v545_v32 = vadd.f32 %v544_v13, %v543_v20 }
 0x12f   : > { %750 = vadd.xlane.f32.xlu0 %v749_v22  ;;  %v561_v4 = vadd.f32 %v560_v15, %v559_v43  ;;  %v2218_v7 = vsub.f32 %v2051_v61, %v576_v50 }
 0x130   : > { %v604_v37 = vmul.f32 %v2192_v26, %v2192_v26  ;;  %v546_v38 = vrot.slane %v545_v32, 1 }
 0x131   : > { %v649_v27 = vld.sshfl [vmem:[#allocation1 + $0x20] sm:$0xff pattern:$0x73625140]  ;;  %v650_v28 = vld.sshfl [vmem:[#allocation1 + $0x28] sm:$0xff pattern:$0x73625140]  ;;  %v608_v11 = vmul.f32 %v2218_v7, %v2218_v7 }
 0x132   : > { %v547_v9 = vadd.f32 %v546_v38, %v545_v32  ;;  %657 = vst [vmem:[#allocation1] ss:$4 sm:$0xff] %v604_v37  ;;  %v742_v35 = vsel %vm369_vm0, %v649_v27, 0.0  ;;  %v743_v29 = vsel %vm369_vm0, %v650_v28, 0.0 }
 0x133   : > { %654 = vst [vmem:[#allocation1 + $0x20] ss:$4 sm:$0xff] %v603_v39  ;;  %v744_v41 = vadd.f32 %v743_v29, %v742_v35  ;;  %v2239_v15 = vpop.permute.xlu0 %1329 }
 0x134   : > { %v575_v48 = vmul.f32 0.001953125, %v547_v9 }
 0x135   : > { %745 = vadd.xlane.f32.xlu2 %v744_v41  ;;  %v2237_v41 = vpop.permute.xlu2 %1333 }
 0x136   : > { %v2211_v56 = vsub.f32 %v2042_v51, %v575_v48  ;;  %v577_v51 = vmul.f32 0.001953125, %v561_v4 }
 0x138   : > { %v607_v10 = vmul.f32 %v2211_v56, %v2211_v56  ;;  %v2225_v17 = vsub.f32 %v2067_v24, %v577_v51 }
 0x139   : > { %v658_v54 = vld.sshfl [vmem:[#allocation1] sm:$0xff pattern:$0x73625140]  ;;  %v659_v55 = vld.sshfl [vmem:[#allocation1 + $0x8] sm:$0xff pattern:$0x73625140] }
 0x13a   : > { %v655_v58 = vld.sshfl [vmem:[#allocation1 + $0x20] sm:$0xff pattern:$0x73625140]  ;;  %v656_v60 = vld.sshfl [vmem:[#allocation1 + $0x28] sm:$0xff pattern:$0x73625140]  ;;  %v609_v38 = vmul.f32 %v2225_v17, %v2225_v17 }
 0x13b   : > { %v752_v49 = vsel %vm369_vm0, %v655_v58, 0.0  ;;  %v753_v0 = vsel %vm369_vm0, %v656_v60, 0.0  ;;  %660 = vst [vmem:[#allocation1 + $0x20] ss:$4 sm:$0xff] %v605_v31  ;;  %v757_v21 = vsel %vm369_vm0, %v658_v54, 0.0  ;;  %v758_v20 = vsel %vm369_vm0, %v659_v55, 0.0 }
 0x13c   : > { %v754_v1 = vadd.f32 %v753_v0, %v752_v49  ;;  %v759_v2 = vadd.f32 %v758_v20, %v757_v21  ;;  %663 = vst [vmem:[#allocation1] ss:$4 sm:$0xff] %v606_v36  ;;  %v1295_v54 = vld [vmem:[%s2514_s2 + $0x18] sm:$0x3]  ;;  %v1293_v60 = vld [vmem:[%s2514_s2 + $0x14] sm:$0x3] }
 0x13d   : > { %v2246_v58 = vpop.permute.xlu1 %1337  ;;  %v1294_v21 = vld [vmem:[%s2514_s2 + $0x16] sm:$0x3] }
 0x13e   : > { %755 = vadd.xlane.f32.xlu1 %v754_v1  ;;  %760 = vadd.xlane.f32.xlu2 %v759_v2 }
 0x142   : > { %v661_v13 = vld.sshfl [vmem:[#allocation1 + $0x20] sm:$0xff pattern:$0x73625140]  ;;  %v662_v16 = vld.sshfl [vmem:[#allocation1 + $0x28] sm:$0xff pattern:$0x73625140] }
 0x143   : > { %v762_v19 = vsel %vm369_vm0, %v661_v13, 0.0  ;;  %v763_v22 = vsel %vm369_vm0, %v662_v16, 0.0  ;;  %666 = vst [vmem:[#allocation1 + $0x20] ss:$4 sm:$0xff] %v607_v10 }
 0x144   : > { %v764_v61 = vadd.f32 %v763_v22, %v762_v19  ;;  %v664_v8 = vld.sshfl [vmem:[#allocation1] sm:$0xff pattern:$0x73625140]  ;;  %v665_v32 = vld.sshfl [vmem:[#allocation1 + $0x8] sm:$0xff pattern:$0x73625140] }
 0x145   : > { %v767_v33 = vsel %vm369_vm0, %v664_v8, 0.0  ;;  %v768_v34 = vsel %vm369_vm0, %v665_v32, 0.0  ;;  %669 = vst [vmem:[#allocation1] ss:$4 sm:$0xff] %v608_v11 }
 0x146   : > { %765 = vadd.xlane.f32.xlu0 %v764_v61  ;;  %v769_v37 = vadd.f32 %v768_v34, %v767_v33 }
 0x148   : > { %770 = vadd.xlane.f32.xlu1 %v769_v37 }
 0x14a   : > { %v667_v24 = vld.sshfl [vmem:[#allocation1 + $0x20] sm:$0xff pattern:$0x73625140]  ;;  %v668_v39 = vld.sshfl [vmem:[#allocation1 + $0x28] sm:$0xff pattern:$0x73625140] }
 0x14b   : > { %v772_v40 = vsel %vm369_vm0, %v667_v24, 0.0  ;;  %v773_v27 = vsel %vm369_vm0, %v668_v39, 0.0  ;;  %672 = vst [vmem:[#allocation1 + $0x20] ss:$4 sm:$0xff] %v609_v38 }
 0x14c   : > { %v774_v43 = vadd.f32 %v773_v27, %v772_v40  ;;  %v670_v9 = vld.sshfl [vmem:[#allocation1] sm:$0xff pattern:$0x73625140]  ;;  %v671_v28 = vld.sshfl [vmem:[#allocation1 + $0x8] sm:$0xff pattern:$0x73625140] }
 0x14d   : > { %v777_v35 = vsel %vm369_vm0, %v670_v9, 0.0  ;;  %v778_v29 = vsel %vm369_vm0, %v671_v28, 0.0 }
 0x14e   : > { %775 = vadd.xlane.f32.xlu2 %v774_v43  ;;  %v779_v46 = vadd.f32 %v778_v29, %v777_v35 }
 0x150   : > { %780 = vadd.xlane.f32.xlu0 %v779_v46 }
 0x15c   : > { %v716_v48 = vpop.xlane.xlu2 %715 }
 0x15d   : > { %v794_v31 = vsel %vm369_vm0, %v716_v48, 0.0 }
 0x15e   : > { %v795_v50 = vrot.slane %v794_v31, 4  ;;  %v721_v55 = vpop.xlane.xlu0 %720 }
 0x15f   : > { %v801_v36 = vsel %vm369_vm0, %v721_v55, 0.0 }
 0x160   : > { %v796_v4 = vadd.f32 %v795_v50, %v794_v31  ;;  %v802_v0 = vrot.slane %v801_v36, 4 }
 0x161   : > { %1349 = vperm.xlu1 %1698, %v1295_v54  }
 0x162   : > { %v797_v49 = vrot.slane %v796_v4, 2  ;;  %v803_v2 = vadd.f32 %v802_v0, %v801_v36 }
 0x164   : > { %v798_v20 = vadd.f32 %v797_v49, %v796_v4  ;;  %1341 = vperm.xlu0 %1699, %v1293_v60   ;;  %v804_v22 = vrot.slane %v803_v2, 2 }
 0x166   : > { %v799_v1 = vrot.slane %v798_v20, 1  ;;  %1345 = vperm.xlu2 %1700, %v1294_v21   ;;  %v805_v24 = vadd.f32 %v804_v22, %v803_v2 }
 0x167   : > { %v731_v51 = vpop.xlane.xlu2 %730 }
 0x168   : > { %v800_v10 = vadd.f32 %v799_v1, %v798_v20  ;;  %v815_v11 = vsel %vm369_vm0, %v731_v51, 0.0  ;;  %v711_v13 = vpop.xlane.xlu1 %710  ;;  %v806_v46 = vrot.slane %v805_v24, 1 }
 0x169   : > { %v816_v16 = vrot.slane %v815_v11, 4  ;;  %v787_v61 = vsel %vm369_vm0, %v711_v13, 0.0 }
 0x16a   : > { %v900_v19 = vmul.f32 0.001953125, %v800_v10  ;;  %v788_v8 = vrot.slane %v787_v61, 4  ;;  %v807_v21 = vadd.f32 %v806_v46, %v805_v24  ;;  %v1092_v24 = vld [vmem:[%s2513_s1 + $0x2] sm:$0x3] }
 0x16b   : > { %v817_v32 = vadd.f32 %v816_v16, %v815_v11  ;;  %v673_v46 = vld.sshfl [vmem:[#allocation1 + $0x20] sm:$0xff pattern:$0x73625140] }
 0x16c   : > { %v916_v33 = vadd.f32 1e-06, %v900_v19  ;;  %v789_v34 = vadd.f32 %v788_v8, %v787_v61  ;;  %v901_v19 = vmul.f32 0.001953125, %v807_v21 }
 0x16d   : > { %v818_v37 = vrot.slane %v817_v32, 2  ;;  %v736_v38 = vpop.xlane.xlu0 %735 }
 0x16e   : > { %1701 = vrsqrt.f32 %v916_v33  ;;  %v822_v39 = vsel %vm369_vm0, %v736_v38, 0.0  ;;  %v790_v40 = vrot.slane %v789_v34, 2  ;;  %vm947_vm2 = vweird.f32 %v916_v33 }
 0x16f   : > { %v819_v27 = vadd.f32 %v818_v37, %v817_v32  ;;  %v823_v43 = vrot.slane %v822_v39, 4  ;;  %v2261_v37 = vadd.f32 1e-06, %v901_v19 }
 0x170   : > { %v791_v9 = vadd.f32 %v790_v40, %v789_v34  ;;  %v726_v28 = vpop.xlane.xlu1 %725 }
 0x171   : > { %v820_v35 = vrot.slane %v819_v27, 1  ;;  %v824_v29 = vadd.f32 %v823_v43, %v822_v39  ;;  %v808_v48 = vsel %vm369_vm0, %v726_v28, 0.0  ;;  %vm957_vm14 = vweird.f32 %v2261_v37 }
 0x172   : > { %v792_v31 = vrot.slane %v791_v9, 1  ;;  %v809_v50 = vrot.slane %v808_v48, 4 }
 0x173   : > { %v821_v54 = vadd.f32 %v820_v35, %v819_v27  ;;  %v825_v55 = vrot.slane %v824_v29, 2 }
 0x174   : > { %v1702_v36 = vpop.eup %1701  ;;  %v793_v60 = vadd.f32 %v792_v31, %v791_v9  ;;  %v810_v49 = vadd.f32 %v809_v50, %v808_v48 }
 0x175   : > { %v942_v4 = vmul.f32 %v1702_v36, %v916_v33  ;;  %v903_v0 = vmul.f32 0.001953125, %v821_v54  ;;  %v826_v20 = vadd.f32 %v825_v55, %v824_v29  ;;  %vm948_vm1 = vweird.f32 %v1702_v36  ;;  %v674_v33 = vld.sshfl [vmem:[#allocation1 + $0x28] sm:$0xff pattern:$0x73625140] }
 0x176   : > { %v899_v1 = vmul.f32 0.001953125, %v793_v60  ;;  %v811_v2 = vrot.slane %v810_v49, 2  ;;  %vm949_vm3 = vmor %vm947_vm2, %vm948_vm1  ;;  %v782_v54 = vsel %vm369_vm0, %v673_v46, 0.0  ;;  %v783_v55 = vsel %vm369_vm0, %v674_v33, 0.0  ;;  %v1095_v33 = vld [vmem:[%s2513_s1 + $0x8] sm:$0x3] }
 0x177   : > { %v2258_v51 = vadd.f32 1e-06, %v903_v0  ;;  %v827_v10 = vrot.slane %v826_v20, 1  ;;  %v943_v11 = vmul.f32 %v1702_v36, %v942_v4  ;;  %v784_v21 = vadd.f32 %v783_v55, %v782_v54 }
 0x178   : > { %v915_v13 = vadd.f32 1e-06, %v899_v1  ;;  %v812_v16 = vadd.f32 %v811_v2, %v810_v49  ;;  %v1091_v2 = vld [vmem:[%s2513_s1] sm:$0x3] }
 0x179   : > { %1703 = vrsqrt.f32 %v2258_v51  ;;  %v944_v22 = vmul.f32 0.5, %v943_v11  ;;  %v828_v8 = vadd.f32 %v827_v10, %v826_v20  ;;  %vm977_vm9 = vweird.f32 %v2258_v51 }
 0x17a   : > { %1705 = vrsqrt.f32 %v915_v13  ;;  %v813_v61 = vrot.slane %v812_v16, 1  ;;  %vm937_vm5 = vweird.f32 %v915_v13 }
 0x17b   : > { %v945_v32 = vsub.f32 1.5, %v944_v22  ;;  %v904_v27 = vmul.f32 0.001953125, %v828_v8  ;;  %1707 = vrsqrt.f32 %v2261_v37 }
 0x17c   : > { %v814_v34 = vadd.f32 %v813_v61, %v812_v16 }
 0x17d   : > { %v946_v38 = vmul.f32 %v1702_v36, %v945_v32  ;;  %v2271_v31 = vadd.f32 1e-06, %v904_v27 }
 0x17e   : > { %v902_v39 = vmul.f32 0.001953125, %v814_v34 }
 0x17f   : > { %v2266_v40 = vpop.eup %1703  ;;  %v950_v43 = vsel %vm949_vm3, %v1702_v36, %v946_v38  ;;  %vm987_vm1 = vweird.f32 %v2271_v31 }
 0x180   : > { %v1706_v9 = vpop.eup %1705  ;;  %v918_v28 = vadd.f32 1e-06, %v902_v39  ;;  %v1108_v35 = vmul.f32 %v1092_v24, %v950_v43  ;;  %v972_v48 = vmul.f32 %v2266_v40, %v2258_v51  ;;  %v1094_v39 = vld [vmem:[%s2513_s1 + $0x6] sm:$0x3]  ;;  %vm978_vm10 = vweird.f32 %v2266_v40 }
 0x181   : > { %v932_v29 = vmul.f32 %v1706_v9, %v915_v13  ;;  %v1708_v4 = vpop.eup %1707  ;;  %vm938_vm4 = vweird.f32 %v1706_v9  ;;  %vm979_vm12 = vmor %vm977_vm9, %vm978_vm10 }
 0x182   : > { %1709 = vrsqrt.f32 %v918_v28  ;;  %1129 = vperm.xlu0 %1699, %v1108_v35   ;;  %v973_v49 = vmul.f32 %v2266_v40, %v972_v48  ;;  %v952_v10 = vmul.f32 %v1708_v4, %v2261_v37  ;;  %vm939_vm6 = vmor %vm937_vm5, %vm938_vm4  ;;  %vm967_vm8 = vweird.f32 %v918_v28 }
 0x183   : > { %v933_v50 = vmul.f32 %v1706_v9, %v932_v29  ;;  %1711 = vrsqrt.f32 %v2271_v31  ;;  %vm958_vm13 = vweird.f32 %v1708_v4 }
 0x184   : > { %v974_v19 = vmul.f32 0.5, %v973_v49  ;;  %v953_v32 = vmul.f32 %v1708_v4, %v952_v10  ;;  %vm959_vm15 = vmor %vm957_vm14, %vm958_vm13 }
 0x185   : > { %v934_v36 = vmul.f32 0.5, %v933_v50 }
 0x186   : > { %v975_v38 = vsub.f32 1.5, %v974_v19  ;;  %v954_v27 = vmul.f32 0.5, %v953_v32 }
 0x187   : > { %v935_v60 = vsub.f32 1.5, %v934_v36 }
 0x188   : > { %v1710_v0 = vpop.eup %1709  ;;  %v955_v46 = vsub.f32 1.5, %v954_v27 }
 0x189   : > { %v962_v20 = vmul.f32 %v1710_v0, %v918_v28  ;;  %v936_v1 = vmul.f32 %v1706_v9, %v935_v60  ;;  %v1712_v61 = vpop.eup %1711  ;;  %vm968_vm7 = vweird.f32 %v1710_v0 }
 0x18a   : > { %v982_v13 = vmul.f32 %v1712_v61, %v2271_v31  ;;  %vm969_vm11 = vmor %vm967_vm8, %vm968_vm7  ;;  %v956_v54 = vmul.f32 %v1708_v4, %v955_v46  ;;  %vm988_vm2 = vweird.f32 %v1712_v61 }
 0x18b   : > { %785 = vadd.xlane.f32.xlu1 %v784_v21  ;;  %v940_v11 = vsel %vm939_vm6, %v1706_v9, %v936_v1  ;;  %v963_v16 = vmul.f32 %v1710_v0, %v962_v20  ;;  %v976_v9 = vmul.f32 %v2266_v40, %v975_v38  ;;  %vm989_vm3 = vmor %vm987_vm1, %vm988_vm2 }
 0x18c   : > { %v1107_v22 = vmul.f32 %v1091_v2, %v940_v11  ;;  %v983_v29 = vmul.f32 %v1712_v61, %v982_v13 }
 0x18d   : > { %v964_v8 = vmul.f32 0.5, %v963_v16  ;;  %v980_v28 = vsel %vm979_vm12, %v2266_v40, %v976_v9  ;;  %v1093_v40 = vld [vmem:[%s2513_s1 + $0x4] sm:$0x3] }
 0x18e   : > { %1125 = vperm.xlu2 %1700, %v1107_v22   ;;  %v984_v48 = vmul.f32 0.5, %v983_v29  ;;  %v1111_v50 = vmul.f32 %v1095_v33, %v980_v28 }
 0x18f   : > { %v965_v34 = vsub.f32 1.5, %v964_v8 }
 0x190   : > { %v985_v60 = vsub.f32 1.5, %v984_v48 }
 0x191   : > { %v966_v24 = vmul.f32 %v1710_v0, %v965_v34 }
 0x192   : > { %v986_v20 = vmul.f32 %v1712_v61, %v985_v60 }
 0x193   : > { %v970_v43 = vsel %vm969_vm11, %v1710_v0, %v966_v24  ;;  %v960_v0 = vsel %vm959_vm15, %v1708_v4, %v956_v54  ;;  %v1096_v4 = vld [vmem:[%s2513_s1 + $0xa] sm:$0x3] }
 0x194   : > { %v1110_v35 = vmul.f32 %v1094_v39, %v970_v43  ;;  %v1109_v1 = vmul.f32 %v1093_v40, %v960_v0  ;;  %v990_v19 = vsel %vm989_vm3, %v1712_v61, %v986_v20 }
 0x195   : > { %v1112_v32 = vmul.f32 %v1096_v4, %v990_v19 }
 0x196   : > { %1137 = vperm.xlu2 %1700, %v1110_v35  }
 0x19a   : > { %v741_v51 = vpop.xlane.xlu1 %740 }
 0x19b   : > { %v829_v55 = vsel %vm369_vm0, %v741_v51, 0.0 }
 0x19c   : > { %v830_v36 = vrot.slane %v829_v55, 4 }
 0x19e   : > { %v831_v49 = vadd.f32 %v830_v36, %v829_v55  ;;  %1141 = vperm.xlu2 %1700, %v1111_v50  }
 0x1a0   : > { %v832_v21 = vrot.slane %v831_v49, 2 }
 0x1a2   : > { %v751_v2 = vpop.xlane.xlu0 %750  ;;  %v833_v10 = vadd.f32 %v832_v21, %v831_v49 }
 0x1a3   : > { %v843_v37 = vsel %vm369_vm0, %v751_v2, 0.0 }
 0x1a4   : > { %1133 = vperm.xlu1 %1698, %v1109_v1   ;;  %v844_v11 = vrot.slane %v843_v37, 4  ;;  %v834_v16 = vrot.slane %v833_v10, 1 }
 0x1a6   : > { %v845_v22 = vadd.f32 %v844_v11, %v843_v37  ;;  %v835_v8 = vadd.f32 %v834_v16, %v833_v10 }
 0x1a8   : > { %v846_v31 = vrot.slane %v845_v22, 2  ;;  %v905_v34 = vmul.f32 0.001953125, %v835_v8  ;;  %v746_v38 = vpop.xlane.xlu2 %745 }
 0x1a9   : > { %v836_v24 = vsel %vm369_vm0, %v746_v38, 0.0 }
 0x1aa   : > { %v847_v13 = vadd.f32 %v846_v31, %v845_v22  ;;  %v921_v39 = vadd.f32 1e-06, %v905_v34  ;;  %v837_v27 = vrot.slane %v836_v24, 4 }
 0x1ac   : > { %v848_v43 = vrot.slane %v847_v13, 1  ;;  %1145 = vperm.xlu1 %1698, %v1112_v32   ;;  %1713 = vrsqrt.f32 %v921_v39  ;;  %v838_v9 = vadd.f32 %v837_v27, %v836_v24  ;;  %vm997_vm5 = vweird.f32 %v921_v39 }
 0x1ae   : > { %v849_v61 = vadd.f32 %v848_v43, %v847_v13  ;;  %v839_v35 = vrot.slane %v838_v9, 2 }
 0x1b0   : > { %v907_v29 = vmul.f32 0.001953125, %v849_v61  ;;  %v840_v46 = vadd.f32 %v839_v35, %v838_v9  ;;  %v1097_v9 = vld [vmem:[%s2513_s1 + $0xc] sm:$0x3] }
 0x1b1   : > { %v756_v28 = vpop.xlane.xlu1 %755  ;;  %v761_v33 = vpop.xlane.xlu2 %760 }
 0x1b2   : > { %v2303_v48 = vadd.f32 1e-06, %v907_v29  ;;  %v850_v51 = vsel %vm369_vm0, %v756_v28, 0.0  ;;  %v857_v50 = vsel %vm369_vm0, %v761_v33, 0.0  ;;  %v1714_v54 = vpop.eup %1713  ;;  %v841_v55 = vrot.slane %v840_v46, 1 }
 0x1b3   : > { %v851_v36 = vrot.slane %v850_v51, 4  ;;  %v858_v60 = vrot.slane %v857_v50, 4  ;;  %v992_v49 = vmul.f32 %v1714_v54, %v921_v39  ;;  %vm998_vm4 = vweird.f32 %v1714_v54 }
 0x1b4   : > { %1715 = vrsqrt.f32 %v2303_v48  ;;  %v842_v0 = vadd.f32 %v841_v55, %v840_v46  ;;  %vm999_vm6 = vmor %vm997_vm5, %vm998_vm4  ;;  %vm1017_vm8 = vweird.f32 %v2303_v48 }
 0x1b5   : > { %v852_v40 = vadd.f32 %v851_v36, %v850_v51  ;;  %v859_v21 = vadd.f32 %v858_v60, %v857_v50  ;;  %v993_v20 = vmul.f32 %v1714_v54, %v992_v49 }
 0x1b6   : > { %v906_v1 = vmul.f32 0.001953125, %v842_v0 }
 0x1b7   : > { %v853_v2 = vrot.slane %v852_v40, 2  ;;  %v860_v10 = vrot.slane %v859_v21, 2  ;;  %v994_v37 = vmul.f32 0.5, %v993_v20 }
 0x1b8   : > { %v2308_v11 = vadd.f32 1e-06, %v906_v1 }
 0x1b9   : > { %v854_v16 = vadd.f32 %v853_v2, %v852_v40  ;;  %v861_v19 = vadd.f32 %v860_v10, %v859_v21  ;;  %v766_v4 = vpop.xlane.xlu0 %765  ;;  %v995_v31 = vsub.f32 1.5, %v994_v37 }
 0x1ba   : > { %v1716_v22 = vpop.eup %1715  ;;  %v864_v8 = vsel %vm369_vm0, %v766_v4, 0.0  ;;  %1717 = vrsqrt.f32 %v2308_v11  ;;  %vm1007_vm11 = vweird.f32 %v2308_v11 }
 0x1bb   : > { %v1012_v32 = vmul.f32 %v1716_v22, %v2303_v48  ;;  %v855_v34 = vrot.slane %v854_v16, 1  ;;  %v862_v38 = vrot.slane %v861_v19, 1  ;;  %v771_v13 = vpop.xlane.xlu1 %770  ;;  %v865_v24 = vrot.slane %v864_v8, 4 }
 0x1bc   : > { %v871_v27 = vsel %vm369_vm0, %v771_v13, 0.0  ;;  %v996_v43 = vmul.f32 %v1714_v54, %v995_v31  ;;  %vm1018_vm7 = vweird.f32 %v1716_v22 }
 0x1bd   : > { %v856_v61 = vadd.f32 %v855_v34, %v854_v16  ;;  %v863_v35 = vadd.f32 %v862_v38, %v861_v19  ;;  %v872_v29 = vrot.slane %v871_v27, 4  ;;  %v1013_v46 = vmul.f32 %v1716_v22, %v1012_v32  ;;  %v1099_v32 = vld [vmem:[%s2513_s1 + $0x10] sm:$0x3]  ;;  %vm1019_vm9 = vmor %vm1017_vm8, %vm1018_vm7 }
 0x1be   : > { %v866_v28 = vadd.f32 %v865_v24, %v864_v8  ;;  %v1000_v33 = vsel %vm999_vm6, %v1714_v54, %v996_v43 }
 0x1bf   : > { %v908_v51 = vmul.f32 0.001953125, %v856_v61  ;;  %v909_v50 = vmul.f32 0.001953125, %v863_v35  ;;  %v873_v55 = vadd.f32 %v872_v29, %v871_v27  ;;  %v1113_v36 = vmul.f32 %v1097_v9, %v1000_v33 }
 0x1c0   : > { %v867_v60 = vrot.slane %v866_v28, 2  ;;  %v1014_v49 = vmul.f32 0.5, %v1013_v46  ;;  %v2317_v0 = vpop.eup %1717 }
 0x1c1   : > { %v2319_v39 = vadd.f32 1e-06, %v908_v51  ;;  %v2321_v40 = vadd.f32 1e-06, %v909_v50  ;;  %v874_v21 = vrot.slane %v873_v55, 2  ;;  %v776_v20 = vpop.xlane.xlu2 %775  ;;  %1149 = vperm.xlu2 %1700, %v1113_v36   ;;  %v1002_v1 = vmul.f32 %v2317_v0, %v2308_v11 }
 0x1c2   : > { %v868_v54 = vadd.f32 %v867_v60, %v866_v28  ;;  %v878_v2 = vsel %vm369_vm0, %v776_v20, 0.0  ;;  %v1015_v10 = vsub.f32 1.5, %v1014_v49  ;;  %vm1008_vm10 = vweird.f32 %v2317_v0 }
 0x1c3   : > { %1719 = vrsqrt.f32 %v2319_v39  ;;  %v875_v37 = vadd.f32 %v874_v21, %v873_v55  ;;  %v781_v16 = vpop.xlane.xlu0 %780  ;;  %v879_v19 = vrot.slane %v878_v2, 4  ;;  %v1003_v24 = vmul.f32 %v2317_v0, %v1002_v1  ;;  %vm1009_vm12 = vmor %vm1007_vm11, %vm1008_vm10 }
 0x1c4   : > { %1721 = vrsqrt.f32 %v2321_v40  ;;  %v869_v4 = vrot.slane %v868_v54, 1  ;;  %v885_v8 = vsel %vm369_vm0, %v781_v16, 0.0  ;;  %v1016_v31 = vmul.f32 %v1716_v22, %v1015_v10 }
 0x1c5   : > { %v876_v34 = vrot.slane %v875_v37, 1  ;;  %v886_v38 = vrot.slane %v885_v8, 4  ;;  %v880_v13 = vadd.f32 %v879_v19, %v878_v2  ;;  %v1004_v46 = vmul.f32 0.5, %v1003_v24  ;;  %v1098_v2 = vld [vmem:[%s2513_s1 + $0xe] sm:$0x3] }
 0x1c6   : > { %v870_v27 = vadd.f32 %v869_v4, %v868_v54  ;;  %v1020_v43 = vsel %vm1019_vm9, %v1716_v22, %v1016_v31  ;;  %vm1027_vm15 = vweird.f32 %v2319_v39  ;;  %vm1037_vm1 = vweird.f32 %v2321_v40 }
 0x1c7   : > { %v877_v48 = vadd.f32 %v876_v34, %v875_v37  ;;  %v887_v9 = vadd.f32 %v886_v38, %v885_v8  ;;  %v881_v61 = vrot.slane %v880_v13, 2  ;;  %v1115_v35 = vmul.f32 %v1099_v32, %v1020_v43 }
 0x1c8   : > { %v910_v29 = vmul.f32 0.001953125, %v870_v27  ;;  %v1005_v49 = vsub.f32 1.5, %v1004_v46  ;;  %v1101_v46 = vld [vmem:[%s2513_s1 + $0x14] sm:$0x3] }
 0x1c9   : > { %v1720_v28 = vpop.eup %1719  ;;  %v911_v33 = vmul.f32 0.001953125, %v877_v48  ;;  %v888_v51 = vrot.slane %v887_v9, 2  ;;  %v882_v50 = vadd.f32 %v881_v61, %v880_v13  ;;  %1157 = vperm.xlu0 %1699, %v1115_v35  }
 0x1ca   : > { %v1722_v55 = vpop.eup %1721  ;;  %v1022_v36 = vmul.f32 %v1720_v28, %v2319_v39  ;;  %v926_v60 = vadd.f32 1e-06, %v910_v29  ;;  %v1006_v54 = vmul.f32 %v2317_v0, %v1005_v49  ;;  %vm1028_vm13 = vweird.f32 %v1720_v28 }
 0x1cb   : > { %v1032_v22 = vmul.f32 %v1722_v55, %v2321_v40  ;;  %v2338_v21 = vadd.f32 1e-06, %v911_v33  ;;  %v889_v20 = vadd.f32 %v888_v51, %v887_v9  ;;  %v883_v1 = vrot.slane %v882_v50, 1  ;;  %vm1029_vm2 = vmor %vm1027_vm15, %vm1028_vm13 }
 0x1cc   : > { %1723 = vrsqrt.f32 %v926_v60  ;;  %v1023_v10 = vmul.f32 %v1720_v28, %v1022_v36  ;;  %v1010_v4 = vsel %vm1009_vm12, %v2317_v0, %v1006_v54  ;;  %vm1038_vm14 = vweird.f32 %v1722_v55  ;;  %v1100_v0 = vld [vmem:[%s2513_s1 + $0x12] sm:$0x3] }
 0x1cd   : > { %1725 = vrsqrt.f32 %v2338_v21  ;;  %v890_v37 = vrot.slane %v889_v20, 1  ;;  %v884_v16 = vadd.f32 %v883_v1, %v882_v50  ;;  %v1033_v19 = vmul.f32 %v1722_v55, %v1032_v22  ;;  %vm1039_vm3 = vmor %vm1037_vm1, %vm1038_vm14 }
 0x1ce   : > { %v1024_v8 = vmul.f32 0.5, %v1023_v10  ;;  %v1114_v34 = vmul.f32 %v1098_v2, %v1010_v4  ;;  %vm1047_vm4 = vweird.f32 %v926_v60  ;;  %vm1057_vm8 = vweird.f32 %v2338_v21 }
 0x1cf   : > { %v891_v31 = vadd.f32 %v890_v37, %v889_v20  ;;  %v912_v32 = vmul.f32 0.001953125, %v884_v16  ;;  %v1034_v38 = vmul.f32 0.5, %v1033_v19 }
 0x1d0   : > { %v1025_v13 = vsub.f32 1.5, %v1024_v8  ;;  %1153 = vperm.xlu1 %1698, %v1114_v34  }
 0x1d1   : > { %v913_v11 = vmul.f32 0.001953125, %v891_v31  ;;  %v928_v24 = vadd.f32 1e-06, %v912_v32  ;;  %v1035_v27 = vsub.f32 1.5, %v1034_v38 }
 0x1d2   : > { %v1724_v43 = vpop.eup %1723  ;;  %v1026_v48 = vmul.f32 %v1720_v28, %v1025_v13 }
 0x1d3   : > { %v1726_v9 = vpop.eup %1725  ;;  %v1042_v61 = vmul.f32 %v1724_v43, %v926_v60  ;;  %v929_v35 = vadd.f32 1e-06, %v913_v11  ;;  %1727 = vrsqrt.f32 %v928_v24  ;;  %v1036_v29 = vmul.f32 %v1722_v55, %v1035_v27  ;;  %v1103_v60 = vld [vmem:[%s2513_s1 + $0x18] sm:$0x3] }
 0x1d4   : > { %v1052_v33 = vmul.f32 %v1726_v9, %v2338_v21  ;;  %v1030_v39 = vsel %vm1029_vm2, %v1720_v28, %v1026_v48  ;;  %vm1048_vm5 = vweird.f32 %v1724_v43  ;;  %vm1058_vm7 = vweird.f32 %v1726_v9  ;;  %v2365_v21 = vpop.permute.xlu2 %1345 }
 0x1d5   : > { %1729 = vrsqrt.f32 %v929_v35  ;;  %v1116_v51 = vmul.f32 %v1100_v0, %v1030_v39  ;;  %v1040_v50 = vsel %vm1039_vm3, %v1722_v55, %v1036_v29  ;;  %v1043_v40 = vmul.f32 %v1724_v43, %v1042_v61  ;;  %vm1049_vm6 = vmor %vm1047_vm4, %vm1048_vm5  ;;  %v1102_v55 = vld [vmem:[%s2513_s1 + $0x16] sm:$0x3] }
 0x1d6   : > { %v1117_v36 = vmul.f32 %v1101_v46, %v1040_v50  ;;  %v1053_v49 = vmul.f32 %v1726_v9, %v1052_v33  ;;  %vm1059_vm9 = vmor %vm1057_vm8, %vm1058_vm7  ;;  %vm1067_vm10 = vweird.f32 %v928_v24  ;;  %vm1077_vm12 = vweird.f32 %v929_v35 }
 0x1d7   : > { %1161 = vperm.xlu2 %1700, %v1116_v51   ;;  %v1044_v22 = vmul.f32 0.5, %v1043_v40 }
 0x1d8   : > { %v1054_v20 = vmul.f32 0.5, %v1053_v49  ;;  %1165 = vperm.xlu1 %1698, %v1117_v36  }
 0x1d9   : > { %v1728_v1 = vpop.eup %1727  ;;  %v1045_v54 = vsub.f32 1.5, %v1044_v22  ;;  %v1298_v22 = vld [vmem:[%s2514_s2 + $0x1e] sm:$0x3] }
 0x1da   : > { %v1062_v2 = vmul.f32 %v1728_v1, %v928_v24  ;;  %v1055_v10 = vsub.f32 1.5, %v1054_v20  ;;  %vm1068_vm11 = vweird.f32 %v1728_v1  ;;  %v1104_v24 = vld [vmem:[%s2513_s1 + $0x1a] sm:$0x3]  ;;  %v2382_v20 = vpop.permute.xlu0 %1341 }
 0x1db   : > { %v1730_v28 = vpop.eup %1729  ;;  %v1046_v37 = vmul.f32 %v1724_v43, %v1045_v54  ;;  %vm1069_vm14 = vmor %vm1067_vm10, %vm1068_vm11  ;;  %v1296_v54 = vld [vmem:[%s2514_s2 + $0x1a] sm:$0x3] }
 0x1dc   : > { %v1072_v16 = vmul.f32 %v1730_v28, %v929_v35  ;;  %v1056_v19 = vmul.f32 %v1726_v9, %v1055_v10  ;;  %v1063_v4 = vmul.f32 %v1728_v1, %v1062_v2  ;;  %vm1078_vm13 = vweird.f32 %v1730_v28  ;;  %v1105_v35 = vld [vmem:[%s2513_s1 + $0x1c] sm:$0x3] }
 0x1dd   : > { %v1050_v8 = vsel %vm1049_vm6, %v1724_v43, %v1046_v37  ;;  %vm1079_vm15 = vmor %vm1077_vm12, %vm1078_vm13  ;;  %v1850_v43 = vmov 269488144   ;;  %v2396_v37 = vpop.permute.xlu1 %1349 }
 0x1de   : > { %v1118_v31 = vmul.f32 %v1102_v55, %v1050_v8  ;;  %v1060_v32 = vsel %vm1059_vm9, %v1726_v9, %v1056_v19  ;;  %v1073_v34 = vmul.f32 %v1730_v28, %v1072_v16  ;;  %v1064_v38 = vmul.f32 0.5, %v1063_v4 }
 0x1df   : > { %v1119_v13 = vmul.f32 %v1103_v60, %v1060_v32  ;;  %v1188_v9 = vunpack.c.l.s4 %v1850_v43 }
 0x1e0   : > { %1169 = vperm.xlu0 %1699, %v1118_v31   ;;  %v1074_v11 = vmul.f32 0.5, %v1073_v34  ;;  %v1065_v27 = vsub.f32 1.5, %v1064_v38 }
 0x1e1   : > { %1173 = vperm.xlu2 %1700, %v1119_v13   ;;  %v2373_v51 = vunpack.c.0.s8 %v1188_v9 }
 0x1e2   : > { %v1075_v48 = vsub.f32 1.5, %v1074_v11  ;;  %v1066_v0 = vmul.f32 %v1728_v1, %v1065_v27 }
 0x1e3   : > { %v1366_v36 = vperm.slane %v2093_v52, %v2373_v51  ;;  %v1378_v2 = vperm.slane %v2102_v62, %v2373_v51  ;;  %v1370_v19 = vperm.slane %v2095_v53, %v2373_v51  ;;  %v1382_v62 = vperm.slane %v2156_v12, %v2373_v51 }
 0x1e4   : > { %v1076_v61 = vmul.f32 %v1730_v28, %v1075_v48  ;;  %v1070_v29 = vsel %vm1069_vm14, %v1728_v1, %v1066_v0 }
 0x1e5   : > { %v1120_v46 = vmul.f32 %v1104_v24, %v1070_v29 }
 0x1e6   : > { %v1080_v33 = vsel %vm1079_vm15, %v1730_v28, %v1076_v61  ;;  %v1374_v61 = vperm.slane %v2091_v57, %v2373_v51 }
 0x1e7   : > { %v1121_v39 = vmul.f32 %v1105_v35, %v1080_v33  ;;  %1177 = vperm.xlu1 %1698, %v1120_v46  }
 0x1e8   : > { %v1126_v50 = vpop.permute.xlu2 %1125 }
 0x1e9   : > { %1181 = vperm.xlu0 %1699, %v1121_v39   ;;  %v1190_v40 = vperm.slane %v1126_v50, %v2373_v51 }
 0x1eb   : > { %v1267_v49 = vmul.f32 %v1190_v40, %v2112_v44 }
 0x1ed   : > { %v1443_v1 = vadd.f32 %v1366_v36, %v1267_v49  ;;  %v1390_v36 = vperm.slane %v2159_v23, %v2373_v51 }
 0x1ef   : > { %1361 = vperm.xlu1 %1698, %v1298_v22   ;;  %1459 = vst [vmem:[%s2389_s29] sm:$0xf] %v1443_v1  ;;  %v1106_v1 = vld [vmem:[%s2513_s1 + $0x1e] sm:$0x3] }
 0x1f0   : > { %v1138_v52 = vpop.permute.xlu2 %1137 }
 0x1f1   : > { %1353 = vperm.xlu0 %1699, %v1296_v54   ;;  %v1202_v44 = vperm.slane %v1138_v52, %v2373_v51  ;;  %v1386_v52 = vperm.slane %v2100_v59, %v2373_v51  ;;  %v1402_v59 = vperm.slane %v2246_v58, %v2373_v51 }
 0x1f3   : > { %v1270_v10 = vmul.f32 %v1202_v44, %v2132_v25 }
 0x1f4   : > { %v1130_v28 = vpop.permute.xlu0 %1129 }
 0x1f5   : > { %v1446_v55 = vadd.f32 %v1378_v2, %v1270_v10  ;;  %v1194_v16 = vperm.slane %v1130_v28, %v2373_v51  ;;  %v1297_v10 = vld [vmem:[%s2514_s2 + $0x1c] sm:$0x3] }
 0x1f7   : > { %1462 = vst [vmem:[%s2389_s29 + $0xc] sm:$0xf] %v1446_v55  ;;  %v1268_v60 = vmul.f32 %v1194_v16, %v2119_v3 }
 0x1f8   : > { %v1142_v4 = vpop.permute.xlu2 %1141 }
 0x1f9   : > { %v1444_v8 = vadd.f32 %v1370_v19, %v1268_v60  ;;  %v1206_v31 = vperm.slane %v1142_v4, %v2373_v51 }
 0x1fb   : > { %1460 = vst [vmem:[%s2389_s29 + $0x4] sm:$0xf] %v1444_v8  ;;  %v1271_v25 = vmul.f32 %v1206_v31, %v2129_v5  ;;  %v1398_v31 = vperm.slane %v2237_v41, %v2373_v51 }
 0x1fd   : > { %v1447_v32 = vadd.f32 %v1382_v62, %v1271_v25  ;;  %v1414_v62 = vperm.slane %v2396_v37, %v2373_v51 }
 0x1fe   : > { %v786_v34 = vpop.xlane.xlu1 %785 }
 0x1ff   : > { %v892_v38 = vsel %vm369_vm0, %v786_v34, 0.0  ;;  %1463 = vst [vmem:[%s2389_s29 + $0x10] sm:$0xf] %v1447_v32 }
 0x200   : > { %v893_v13 = vrot.slane %v892_v38, 4 }
 0x202   : > { %v894_v53 = vadd.f32 %v893_v13, %v892_v38  ;;  %v1394_v13 = vperm.slane %v2239_v15, %v2373_v51 }
 0x204   : > { %v895_v11 = vrot.slane %v894_v53, 2 }
 0x206   : > { %v896_v27 = vadd.f32 %v895_v11, %v894_v53 }
 0x208   : > { %v897_v3 = vrot.slane %v896_v27, 1 }
 0x20a   : > { %v898_v48 = vadd.f32 %v897_v3, %v896_v27 }
 0x20c   : > { %v914_v0 = vmul.f32 0.001953125, %v898_v48 }
 0x20e   : > { %v930_v24 = vadd.f32 1e-06, %v914_v0 }
 0x210   : > { %1731 = vrsqrt.f32 %v930_v24  ;;  %vm1087_vm1 = vweird.f32 %v930_v24 }
 0x216   : > { %v1732_v43 = vpop.eup %1731  ;;  %v1134_v12 = vpop.permute.xlu1 %1133 }
 0x217   : > { %v1082_v9 = vmul.f32 %v1732_v43, %v930_v24  ;;  %v1198_v5 = vperm.slane %v1134_v12, %v2373_v51  ;;  %vm1088_vm0 = vweird.f32 %v1732_v43 }
 0x218   : > { %vm1089_vm2 = vmor %vm1087_vm1, %vm1088_vm0 }
 0x219   : > { %v1269_v35 = vmul.f32 %v1198_v5, %v2122_v6  ;;  %v1083_v29 = vmul.f32 %v1732_v43, %v1082_v9 }
 0x21b   : > { %v1445_v46 = vadd.f32 %v1374_v61, %v1269_v35  ;;  %v1150_v33 = vpop.permute.xlu2 %1149  ;;  %v1084_v39 = vmul.f32 0.5, %v1083_v29 }
 0x21c   : > { %v1214_v50 = vperm.slane %v1150_v33, %v2373_v51 }
 0x21d   : > { %1461 = vst [vmem:[%s2389_s29 + $0x8] sm:$0xf] %v1445_v46  ;;  %v1085_v40 = vsub.f32 1.5, %v1084_v39 }
 0x21e   : > { %v1146_v49 = vpop.permute.xlu1 %1145  ;;  %v1273_v22 = vmul.f32 %v1214_v50, %v2165_v30 }
 0x21f   : > { %v1210_v57 = vperm.slane %v1146_v49, %v2373_v51  ;;  %v1086_v6 = vmul.f32 %v1732_v43, %v1085_v40 }
 0x220   : > { %v1449_v54 = vadd.f32 %v1390_v36, %v1273_v22 }
 0x221   : > { %v1272_v23 = vmul.f32 %v1210_v57, %v2141_v14  ;;  %v1090_v44 = vsel %vm1089_vm2, %v1732_v43, %v1086_v6 }
 0x222   : > { %1465 = vst [vmem:[%s2389_s29 + $0x18] sm:$0xf] %v1449_v54  ;;  %v1122_v2 = vmul.f32 %v1106_v1, %v1090_v44 }
 0x223   : > { %v1448_v30 = vadd.f32 %v1386_v52, %v1272_v23 }
 0x224   : > { %1185 = vperm.xlu2 %1700, %v1122_v2  }
 0x225   : > { %1464 = vst [vmem:[%s2389_s29 + $0x14] sm:$0xf] %v1448_v30 }
 0x22c   : > { %1357 = vperm.xlu2 %1700, %v1297_v10  }
 0x231   : > { %v1162_v28 = vpop.permute.xlu2 %1161 }
 0x232   : > { %v1226_v55 = vperm.slane %v1162_v28, %v2373_v51 }
 0x234   : > { %v1276_v14 = vmul.f32 %v1226_v55, %v2189_v18 }
 0x236   : > { %v1452_v16 = vadd.f32 %v1402_v59, %v1276_v14 }
 0x238   : > { %1468 = vst [vmem:[%s2389_s29 + $0x24] sm:$0xf] %v1452_v16 }
 0x23b   : > { %v1174_v19 = vpop.permute.xlu2 %1173  ;;  %v1158_v60 = vpop.permute.xlu0 %1157 }
 0x23c   : > { %v1238_v4 = vperm.slane %v1174_v19, %v2373_v51  ;;  %v1222_v8 = vperm.slane %v1158_v60, %v2373_v51 }
 0x23e   : > { %v1279_v25 = vmul.f32 %v1238_v4, %v2204_v42  ;;  %v1275_v58 = vmul.f32 %v1222_v8, %v2171_v63  ;;  %v1406_v63 = vperm.slane %v2382_v20, %v2373_v51 }
 0x240   : > { %v1455_v18 = vadd.f32 %v1414_v62, %v1279_v25  ;;  %v1451_v32 = vadd.f32 %v1398_v31, %v1275_v58 }
 0x242   : > { %1471 = vst [vmem:[%s2389_s29 + $0x30] sm:$0xf] %v1455_v18  ;;  %v1154_v34 = vpop.permute.xlu1 %1153 }
 0x243   : > { %1467 = vst [vmem:[%s2389_s29 + $0x20] sm:$0xf] %v1451_v32  ;;  %v1218_v38 = vperm.slane %v1154_v34, %v2373_v51 }
 0x245   : > { %v1274_v41 = vmul.f32 %v1218_v38, %v2181_v47  ;;  %v1410_v47 = vperm.slane %v2365_v21, %v2373_v51 }
 0x247   : > { %v1450_v53 = vadd.f32 %v1394_v13, %v1274_v41 }
 0x249   : > { %1466 = vst [vmem:[%s2389_s29 + $0x1c] sm:$0xf] %v1450_v53 }
 0x24a   : > { %v1166_v37 = vpop.permute.xlu1 %1165 }
 0x24b   : > { %v1230_v42 = vperm.slane %v1166_v37, %v2373_v51 }
 0x24d   : > { %v1277_v11 = vmul.f32 %v1230_v42, %v2192_v26 }
 0x24f   : > { %v1453_v27 = vadd.f32 %v1406_v63, %v1277_v11 }
 0x251   : > { %1469 = vst [vmem:[%s2389_s29 + $0x28] sm:$0xf] %v1453_v27 }
 0x252   : > { %v1170_v3 = vpop.permute.xlu0 %1169 }
 0x253   : > { %v1234_v48 = vperm.slane %v1170_v3, %v2373_v51 }
 0x255   : > { %v1278_v15 = vmul.f32 %v1234_v48, %v2200_v45 }
 0x257   : > { %v1454_v0 = vadd.f32 %v1410_v47, %v1278_v15 }
 0x259   : > { %1470 = vst [vmem:[%s2389_s29 + $0x2c] sm:$0xf] %v1454_v0  ;;  %v1178_v43 = vpop.permute.xlu1 %1177 }
 0x25a   : > { %v1242_v20 = vperm.slane %v1178_v43, %v2373_v51 }
 0x25b   : > { %v1182_v24 = vpop.permute.xlu0 %1181 }
 0x25c   : > { %v1280_v12 = vmul.f32 %v1242_v20, %v2211_v56  ;;  %v1246_v56 = vperm.slane %v1182_v24, %v2373_v51 }
 0x25e   : > { %v1281_v39 = vmul.f32 %v1246_v56, %v2218_v7 }
 0x261   : > { %v1362_v61 = vpop.permute.xlu1 %1361 }
 0x262   : > { %v1426_v45 = vperm.slane %v1362_v61, %v2373_v51 }
 0x263   : > { %v1354_v26 = vpop.permute.xlu0 %1353 }
 0x264   : > { %v1418_v9 = vperm.slane %v1354_v26, %v2373_v51 }
 0x266   : > { %v1456_v5 = vadd.f32 %v1418_v9, %v1280_v12 }
 0x268   : > { %1472 = vst [vmem:[%s2389_s29 + $0x34] sm:$0xf] %v1456_v5 }
 0x27e   : > { %v1186_v35 = vpop.permute.xlu2 %1185 }
 0x27f   : > { %v1250_v21 = vperm.slane %v1186_v35, %v2373_v51 }
 0x281   : > { %v1282_v29 = vmul.f32 %v1250_v21, %v2225_v17 }
 0x283   : > { %v1458_v46 = vadd.f32 %v1426_v45, %v1282_v29 }
 0x285   : > { %1474 = vst [vmem:[%s2389_s29 + $0x3c] sm:$0xf] %v1458_v46 }
 0x286   : > { %v1358_v33 = vpop.permute.xlu2 %1357 }
 0x287   : > { %v1422_v50 = vperm.slane %v1358_v33, %v2373_v51 }
 0x289   : > { %v1457_v40 = vadd.f32 %v1422_v50, %v1281_v39 }
 0x28b   : > { %1473 = vst [vmem:[%s2389_s29 + $0x38] sm:$0xf] %v1457_v40 }
 0x28c   : > { %1790 = shalt.err (!%p1787_p13)
}
 0x28d   : > { %s1851_s19 = smov 64   ;;  %s1852_s29 = smov 4  }
 0x28e   : > { %1632 = dma.vmem_to_hbm [thread:$0]  (%p1924_p9), %s1492_s8, 1024, %s1494_s9, %s1476_s15, %s1851_s19, %s1851_s19, %s1852_s29  }
 0x28f PF: > { %s1508_s30 = sand.u32 1, %s1825_s12   ;;  %p1639_p0 = pnand %p1616_p12, %p1931_p11 }
 0x290   : > { %s1509_s4 = scalar_lea.sflag [#allocation4], %s1508_s30 }
 0x291   : > { %p1640_p1 = pneg %p1639_p0 }
 0x293   : > { %1820 = dma.done.wait (%p1640_p1), %s1509_s4, 1024  }
 0x294   : > { %1822 = vsyncadd (%p1640_p1), %s1509_s4, 4294966272  ;;  %s19_s17 = sadd.s32 1, %s1845_s17   ;;  %s2520_s12 = smov %s1829_s13 }
 0x295   : > { %p16_p2 = scmp.ge.s32.totalorder %s19_s17, 4   ;;  %s2521_s13 = smov %s1833_s14 }
 0x296   : > { %s2522_s14 = smov %s1929_s26  ;;  %s2523_s15 = smov %s1841_s16 }
 0x297   : > { %s2524_s16 = smov %s2526_s20  ;;  %18 = sbr.rel (!%p16_p2) target bundleno = 6 (0x6), region = 85 }
 0x29c   :  { %1515 = vsyncpa [#allocation3], 1 }
 0x29d   :  { %1517 = vsyncpa [#allocation3 + $0x1], 1 }
 0x29e   :  { %1518 = vsyncpa [#allocation4], 1 }
 0x29f   :  { %1520 = vsyncpa [#allocation4 + $0x1], 1 }

</bundles_post_ra>
